<compile_context>
chip_gen: v7x
topology: tpu7x:2x2x1
jax: 0.10.0
libtpu: 0.0.40
codegen_flags: <defaults>
</compile_context>

<pallas_src>
import functools
import math

import jax
import jax.numpy as jnp
from jax.experimental import pallas as pl
from jax.experimental.pallas import tpu as pltpu


def _layer_norm(x, gamma, beta, eps=1e-5):
    # x: (TQ, E) f32; gamma/beta: (1, E) f32
    mu = jnp.mean(x, axis=-1, keepdims=True)
    var = jnp.mean((x - mu) ** 2, axis=-1, keepdims=True)
    return (x - mu) * jax.lax.rsqrt(var + eps) * gamma + beta


def _heads_major(x2, n_heads, d):
    # (len, H*d) -> (H, len, d): head-major repack via static lane slices.
    # Pure layout data movement (equivalent to a transpose), feeds the batched
    # einsums below so the MXU sees fused all-head matmuls.
    return jnp.stack([x2[:, h * d:(h + 1) * d] for h in range(n_heads)], axis=0)


def decoder_layer_kernel(xq_ref, xkv_ref, mask_ref,
                         wq_ref, wkv_ref, wfc_ref,
                         g1_ref, b1_ref, w1_ref, w2_ref, g2_ref, b2_ref,
                         y_ref, attn_ref,
                         k_sc, v_sc,
                         *, num_heads, d_k, d_v):
    f32 = jnp.float32
    bf16 = jnp.bfloat16
    H = num_heads

    # --- K/V projection: once per batch row, cached across query tiles ---
    @pl.when(pl.program_id(1) == 0)
    def _():
        xkv_b = xkv_ref[0].astype(bf16)                        # (S, E)
        kv2 = jnp.dot(xkv_b, wkv_ref[...],
                      preferred_element_type=f32)              # (S, H*(dk+dv))
        k_sc[...] = _heads_major(kv2[:, :H * d_k], H, d_k).astype(bf16)
        v_sc[...] = _heads_major(kv2[:, H * d_k:], H, d_v).astype(bf16)

    xq = xq_ref[0]        # (TQ, E) f32 -- query tile (also the residual)
    mask = mask_ref[0]    # (TQ, S) f32, nonzero => masked (filled with -1e9)

    # --- Q projection (1/sqrt(d_k) pre-folded into w_q in the wrapper) ---
    q2 = jnp.dot(xq.astype(bf16), wq_ref[...],
                 preferred_element_type=f32)                   # (TQ, H*dk)
    q3 = _heads_major(q2, H, d_k).astype(bf16)                 # (H, TQ, dk)

    # --- all-head scores in one batched dot (no explicit transpose) ---
    scores = jnp.einsum("hqd,hkd->hqk", q3, k_sc[...],
                        preferred_element_type=f32)            # (H, TQ, S)
    scores = jnp.where(mask[None, :, :] != 0.0, jnp.float32(-1e9), scores)

    m = jnp.max(scores, axis=-1, keepdims=True)
    e = jnp.exp(scores - m)
    denom = jnp.sum(e, axis=-1, keepdims=True)
    probs = e * pl.reciprocal(denom, approx=True)              # (H, TQ, S)
    attn_ref[0] = probs

    # --- context and output projection (batched over heads, summed) ---
    ctx = jnp.einsum("hqk,hkd->hqd", probs.astype(bf16), v_sc[...],
                     preferred_element_type=f32)               # (H, TQ, dv)
    proj = jnp.einsum("hqd,hde->hqe", ctx.astype(bf16), wfc_ref[...],
                      preferred_element_type=f32)              # (H, TQ, E)
    attn_out = jnp.sum(proj, axis=0) + xq    # == concat(heads) @ Wfc + residual
    y1 = _layer_norm(attn_out, g1_ref[...], b1_ref[...])

    # --- position-wise FFN: Linear -> ReLU -> Linear, residual, LayerNorm ---
    h1 = jnp.maximum(jnp.dot(y1.astype(bf16), w1_ref[...],
                             preferred_element_type=f32), 0.0)
    h2 = jnp.dot(h1.astype(bf16), w2_ref[...], preferred_element_type=f32) + y1
    y_ref[0] = _layer_norm(h2, g2_ref[...], b2_ref[...])
    # TODO(synk): dropout (p=0.1) omitted -- eval-mode (identity) semantics.
    # TODO(synk): for very large E/d_ff the FFN weights should be K-tiled over a
    # third ("arbitrary") grid axis with a VMEM accumulator; not needed here.


def decoder_layer(x, attn_mask, params, *, num_heads, d_k, d_v):
    """x: (B, S, E) f32; attn_mask: None, (S, S) or (B, S, S) f32 (nonzero = masked)."""
    B, S, E = x.shape
    H = num_heads
    d_ff = params["w1"].shape[1]

    # query tiling (degenerates to a single tile at small S)
    TQ = 128 if S % 128 == 0 else S
    n_q = S // TQ

    # mask: prefer a single (1, S, S) block shared across the batch
    if attn_mask is None:
        attn_mask = jnp.zeros((S, S), jnp.float32)
    attn_mask = jnp.asarray(attn_mask, jnp.float32)
    mask3 = attn_mask[None] if attn_mask.ndim == 2 else attn_mask
    shared = mask3.shape[0] == 1
    mask_map = (lambda b, q: (0, q, 0)) if shared else (lambda b, q: (b, q, 0))

    # weights in bf16 (MXU operands); 1/sqrt(dk) folded into wq; wk & wv fused;
    # fc in head-major (H, dv, E) layout
    bf16 = jnp.bfloat16
    wq = (params["wq"] * (1.0 / math.sqrt(d_k))).astype(bf16)   # (E, H*dk)
    wkv = jnp.concatenate([params["wk"], params["wv"]],
                          axis=1).astype(bf16)                  # (E, H*(dk+dv))
    wfc3 = params["wfc"].reshape(H, d_v, E).astype(bf16)        # (H, dv, E)
    w1 = params["w1"].astype(bf16)                              # (E, d_ff)
    w2 = params["w2"].astype(bf16)                              # (d_ff, E)
    g1, b1 = params["ln1_g"], params["ln1_b"]
    g2, b2 = params["ln2_g"], params["ln2_b"]

    kernel = functools.partial(decoder_layer_kernel,
                               num_heads=H, d_k=d_k, d_v=d_v)

    const2d = lambda shape: pl.BlockSpec(shape, lambda b, q: (0, 0))
    const3d = lambda shape: pl.BlockSpec(shape, lambda b, q: (0, 0, 0))

    out_shapes = (
        jax.ShapeDtypeStruct((B, S, E), jnp.float32),
        jax.ShapeDtypeStruct((B, H, S, S), jnp.float32),
    )

    # Advisory VMEM budget: double-buffered blocks + scratch + intermediate
    # headroom, clamped to [32 MiB, 48 MiB] (safe on v5e/v6e 128 MiB, v7x 64 MiB).
    f32b, bf16b = 4, 2
    blocks = (TQ * E + S * E + TQ * S + TQ * E + H * TQ * S) * f32b
    blocks += (E * H * d_k + E * H * (d_k + d_v) + H * d_v * E
               + E * d_ff + d_ff * E) * bf16b
    blocks += 4 * E * f32b
    scratch = H * S * (d_k + d_v) * bf16b
    headroom = 6 * (H * TQ * S + TQ * d_ff + S * H * (d_k + d_v)) * f32b
    vmem_limit = int(min(max(2 * blocks + scratch + headroom, 32 * 2**20),
                         48 * 2**20))

    return pl.pallas_call(
        kernel,
        out_shape=out_shapes,
        grid_spec=pltpu.PrefetchScalarGridSpec(
            num_scalar_prefetch=0,
            grid=(B, n_q),
            in_specs=[
                pl.BlockSpec((1, TQ, E), lambda b, q: (b, q, 0)),   # x (query tile)
                pl.BlockSpec((1, S, E), lambda b, q: (b, 0, 0)),    # x (full seq, K/V)
                pl.BlockSpec((1, TQ, S), mask_map),                 # mask (shared)
                const2d((E, H * d_k)),                              # w_q (pre-scaled)
                const2d((E, H * (d_k + d_v))),                      # w_k|w_v fused
                const3d((H, d_v, E)),                               # fc (head-major)
                const2d((1, E)), const2d((1, E)),                   # ln1 gamma/beta
                const2d((E, d_ff)), const2d((d_ff, E)),             # ffn w1 / w2
                const2d((1, E)), const2d((1, E)),                   # ln2 gamma/beta
            ],
            out_specs=[
                pl.BlockSpec((1, TQ, E), lambda b, q: (b, q, 0)),
                pl.BlockSpec((1, H, TQ, S), lambda b, q: (b, 0, q, 0)),
            ],
            scratch_shapes=[
                pltpu.VMEM((H, S, d_k), bf16),   # cached K (head-major)
                pltpu.VMEM((H, S, d_v), bf16),   # cached V (head-major)
            ],
        ),
        compiler_params=pltpu.CompilerParams(
            dimension_semantics=("parallel", "arbitrary"),
            vmem_limit_bytes=vmem_limit),
    )(x, x, mask3, wq, wkv, wfc3, g1, b1, w1, w2, g2, b2)


def init_params(key, embed_dim, d_k, d_v, d_ff, num_heads):
    ks = jax.random.split(key, 6)
    u = lambda k, shape, fan_in: jax.random.uniform(
        k, shape, jnp.float32, -1.0 / math.sqrt(fan_in), 1.0 / math.sqrt(fan_in))
    return {
        # stored as (in, out) == PyTorch weight.T
        "wq": u(ks[0], (embed_dim, d_k * num_heads), embed_dim),
        "wk": u(ks[1], (embed_dim, d_k * num_heads), embed_dim),
        "wv": u(ks[2], (embed_dim, d_v * num_heads), embed_dim),
        "wfc": u(ks[3], (num_heads * d_v, embed_dim), num_heads * d_v),
        "ln1_g": jnp.ones((1, embed_dim), jnp.float32),
        "ln1_b": jnp.zeros((1, embed_dim), jnp.float32),
        "w1": u(ks[4], (embed_dim, d_ff), embed_dim),
        "w2": u(ks[5], (d_ff, embed_dim), d_ff),
        "ln2_g": jnp.ones((1, embed_dim), jnp.float32),
        "ln2_b": jnp.zeros((1, embed_dim), jnp.float32),
    }


if __name__ == "__main__":
    B, S, E = 2, 8, 32
    d_k, d_v, d_ff, num_heads = 16, 16, 64, 4

    key = jax.random.PRNGKey(0)
    k_x, k_p = jax.random.split(key)
    x = jax.random.normal(k_x, (B, S, E), jnp.float32)

    # causal mask shared across the batch: 1.0 where attention is forbidden (j > i)
    causal = (jnp.arange(S)[None, :] > jnp.arange(S)[:, None]).astype(jnp.float32)

    params = init_params(k_p, E, d_k, d_v, d_ff, num_heads)

    y, attn = decoder_layer(x, causal, params,
                            num_heads=num_heads, d_k=d_k, d_v=d_v)
    jax.block_until_ready((y, attn))

    assert y.shape == (B, S, E) and attn.shape == (B, num_heads, S, S)
    assert bool(jnp.all(jnp.isfinite(y))) and bool(jnp.all(jnp.isfinite(attn)))
    row_sums = jnp.sum(attn, axis=-1)
    assert bool(jnp.all(jnp.abs(row_sums - 1.0) < 5e-2))
    print("KERNEL_OK")
</pallas_src>

<mosaic_0001>
module attributes {stable_mosaic.version = 11 : i64} {
  func.func @decoder_layer_kernel(%arg0: i32, %arg1: i32, %arg2: memref<1x8x32xf32, #tpu.memory_space<vmem>>, %arg3: memref<1x8x32xf32, #tpu.memory_space<vmem>>, %arg4: memref<1x8x8xf32, #tpu.memory_space<vmem>>, %arg5: memref<32x64xbf16, #tpu.memory_space<vmem>>, %arg6: memref<32x128xbf16, #tpu.memory_space<vmem>>, %arg7: memref<4x16x32xbf16, #tpu.memory_space<vmem>>, %arg8: memref<1x32xf32, #tpu.memory_space<vmem>>, %arg9: memref<1x32xf32, #tpu.memory_space<vmem>>, %arg10: memref<32x64xbf16, #tpu.memory_space<vmem>>, %arg11: memref<64x32xbf16, #tpu.memory_space<vmem>>, %arg12: memref<1x32xf32, #tpu.memory_space<vmem>>, %arg13: memref<1x32xf32, #tpu.memory_space<vmem>>, %arg14: memref<1x8x32xf32, #tpu.memory_space<vmem>>, %arg15: memref<1x4x8x8xf32, #tpu.memory_space<vmem>>, %arg16: memref<4x8x16xbf16, #tpu.memory_space<vmem>>, %arg17: memref<4x8x16xbf16, #tpu.memory_space<vmem>>) attributes {dimension_semantics = [#tpu.dimension_semantics<parallel>, #tpu.dimension_semantics<arbitrary>], iteration_bounds = array<i64: 2, 1>, scalar_prefetch = 0 : i64, scratch_operands = 2 : i64, tpu.core_type = #tpu.core_type<tc>, window_params = [{transform_indices = @transform_0, window_bounds = array<i64: 1, 8, 32>}, {transform_indices = @transform_1, window_bounds = array<i64: 1, 8, 32>}, {transform_indices = @transform_2, window_bounds = array<i64: 1, 8, 8>}, {pipeline_mode = #tpu.pipeline_mode<synchronous>, transform_indices = @transform_3, window_bounds = array<i64: 32, 64>}, {pipeline_mode = #tpu.pipeline_mode<synchronous>, transform_indices = @transform_4, window_bounds = array<i64: 32, 128>}, {pipeline_mode = #tpu.pipeline_mode<synchronous>, transform_indices = @transform_5, window_bounds = array<i64: 4, 16, 32>}, {pipeline_mode = #tpu.pipeline_mode<synchronous>, transform_indices = @transform_6, window_bounds = array<i64: 1, 32>}, {pipeline_mode = #tpu.pipeline_mode<synchronous>, transform_indices = @transform_7, window_bounds = array<i64: 1, 32>}, {pipeline_mode = #tpu.pipeline_mode<synchronous>, transform_indices = @transform_8, window_bounds = array<i64: 32, 64>}, {pipeline_mode = #tpu.pipeline_mode<synchronous>, transform_indices = @transform_9, window_bounds = array<i64: 64, 32>}, {pipeline_mode = #tpu.pipeline_mode<synchronous>, transform_indices = @transform_10, window_bounds = array<i64: 1, 32>}, {pipeline_mode = #tpu.pipeline_mode<synchronous>, transform_indices = @transform_11, window_bounds = array<i64: 1, 32>}, {transform_indices = @transform_12, window_bounds = array<i64: 1, 8, 32>}, {transform_indices = @transform_13, window_bounds = array<i64: 1, 4, 8, 8>}]} {
    %c0_i32 = arith.constant 0 : i32
    %0 = arith.cmpi eq, %arg1, %c0_i32 : i32
    %1 = arith.extui %0 : i1 to i32
    %c0_i32_0 = arith.constant 0 : i32
    %2 = arith.cmpi ne, %1, %c0_i32_0 : i32
    scf.if %2 {
      %c0_57 = arith.constant 0 : index
      %c0_58 = arith.constant 0 : index
      %c0_59 = arith.constant 0 : index
      %110 = vector.load %arg3[%c0_57, %c0_58, %c0_59] : memref<1x8x32xf32, #tpu.memory_space<vmem>>, vector<1x8x32xf32>
      %111 = vector.shape_cast %110 : vector<1x8x32xf32> to vector<8x32xf32>
      %112 = arith.truncf %111 : vector<8x32xf32> to vector<8x32xbf16>
      %c0_60 = arith.constant 0 : index
      %c0_61 = arith.constant 0 : index
      %113 = vector.load %arg6[%c0_60, %c0_61] : memref<32x128xbf16, #tpu.memory_space<vmem>>, vector<32x128xbf16>
      %cst_62 = arith.constant dense<0.000000e+00> : vector<8x128xf32>
      %114 = tpu.matmul %112, %113, %cst_62 {dimension_numbers = #tpu.dot_dimension_numbers<[1], [0], [0], [1], [0, 0, 1, 1], [], []>} : vector<8x32xbf16>, vector<32x128xbf16>, vector<8x128xf32> -> vector<8x128xf32>
      %115 = vector.extract_strided_slice %114 {offsets = [0, 0], sizes = [8, 64], strides = [1, 1]} : vector<8x128xf32> to vector<8x64xf32>
      %116 = vector.extract_strided_slice %115 {offsets = [0, 0], sizes = [8, 16], strides = [1, 1]} : vector<8x64xf32> to vector<8x16xf32>
      %117 = vector.extract_strided_slice %115 {offsets = [0, 16], sizes = [8, 16], strides = [1, 1]} : vector<8x64xf32> to vector<8x16xf32>
      %118 = vector.extract_strided_slice %115 {offsets = [0, 32], sizes = [8, 16], strides = [1, 1]} : vector<8x64xf32> to vector<8x16xf32>
      %119 = vector.extract_strided_slice %115 {offsets = [0, 48], sizes = [8, 16], strides = [1, 1]} : vector<8x64xf32> to vector<8x16xf32>
      %120 = vector.shape_cast %116 : vector<8x16xf32> to vector<1x8x16xf32>
      %121 = vector.shape_cast %117 : vector<8x16xf32> to vector<1x8x16xf32>
      %122 = vector.shape_cast %118 : vector<8x16xf32> to vector<1x8x16xf32>
      %123 = vector.shape_cast %119 : vector<8x16xf32> to vector<1x8x16xf32>
      %124 = tpu.concatenate %120, %121, %122, %123 in 0 : vector<1x8x16xf32>, vector<1x8x16xf32>, vector<1x8x16xf32>, vector<1x8x16xf32> -> vector<4x8x16xf32>
      %125 = arith.truncf %124 : vector<4x8x16xf32> to vector<4x8x16xbf16>
      %c0_63 = arith.constant 0 : index
      %c0_64 = arith.constant 0 : index
      %c0_65 = arith.constant 0 : index
      %126 = vector.load %arg16[%c0_63, %c0_64, %c0_65] : memref<4x8x16xbf16, #tpu.memory_space<vmem>>, vector<4x8x16xbf16>
      tpu.vector_store %arg16[%c0_63, %c0_64, %c0_65], %125 {strides = array<i32>} : memref<4x8x16xbf16, #tpu.memory_space<vmem>>, vector<4x8x16xbf16>,
      %127 = vector.extract_strided_slice %114 {offsets = [0, 64], sizes = [8, 64], strides = [1, 1]} : vector<8x128xf32> to vector<8x64xf32>
      %128 = vector.extract_strided_slice %127 {offsets = [0, 0], sizes = [8, 16], strides = [1, 1]} : vector<8x64xf32> to vector<8x16xf32>
      %129 = vector.extract_strided_slice %127 {offsets = [0, 16], sizes = [8, 16], strides = [1, 1]} : vector<8x64xf32> to vector<8x16xf32>
      %130 = vector.extract_strided_slice %127 {offsets = [0, 32], sizes = [8, 16], strides = [1, 1]} : vector<8x64xf32> to vector<8x16xf32>
      %131 = vector.extract_strided_slice %127 {offsets = [0, 48], sizes = [8, 16], strides = [1, 1]} : vector<8x64xf32> to vector<8x16xf32>
      %132 = vector.shape_cast %128 : vector<8x16xf32> to vector<1x8x16xf32>
      %133 = vector.shape_cast %129 : vector<8x16xf32> to vector<1x8x16xf32>
      %134 = vector.shape_cast %130 : vector<8x16xf32> to vector<1x8x16xf32>
      %135 = vector.shape_cast %131 : vector<8x16xf32> to vector<1x8x16xf32>
      %136 = tpu.concatenate %132, %133, %134, %135 in 0 : vector<1x8x16xf32>, vector<1x8x16xf32>, vector<1x8x16xf32>, vector<1x8x16xf32> -> vector<4x8x16xf32>
      %137 = arith.truncf %136 : vector<4x8x16xf32> to vector<4x8x16xbf16>
      %c0_66 = arith.constant 0 : index
      %c0_67 = arith.constant 0 : index
      %c0_68 = arith.constant 0 : index
      %138 = vector.load %arg17[%c0_66, %c0_67, %c0_68] : memref<4x8x16xbf16, #tpu.memory_space<vmem>>, vector<4x8x16xbf16>
      tpu.vector_store %arg17[%c0_66, %c0_67, %c0_68], %137 {strides = array<i32>} : memref<4x8x16xbf16, #tpu.memory_space<vmem>>, vector<4x8x16xbf16>,
    } else {
    }
    %c0 = arith.constant 0 : index
    %c0_1 = arith.constant 0 : index
    %c0_2 = arith.constant 0 : index
    %3 = vector.load %arg2[%c0, %c0_1, %c0_2] : memref<1x8x32xf32, #tpu.memory_space<vmem>>, vector<1x8x32xf32>
    %4 = vector.shape_cast %3 : vector<1x8x32xf32> to vector<8x32xf32>
    %c0_3 = arith.constant 0 : index
    %c0_4 = arith.constant 0 : index
    %c0_5 = arith.constant 0 : index
    %5 = vector.load %arg4[%c0_3, %c0_4, %c0_5] : memref<1x8x8xf32, #tpu.memory_space<vmem>>, vector<1x8x8xf32>
    %6 = vector.shape_cast %5 : vector<1x8x8xf32> to vector<8x8xf32>
    %7 = arith.truncf %4 : vector<8x32xf32> to vector<8x32xbf16>
    %c0_6 = arith.constant 0 : index
    %c0_7 = arith.constant 0 : index
    %8 = vector.load %arg5[%c0_6, %c0_7] : memref<32x64xbf16, #tpu.memory_space<vmem>>, vector<32x64xbf16>
    %cst = arith.constant dense<0.000000e+00> : vector<8x64xf32>
    %9 = tpu.matmul %7, %8, %cst {dimension_numbers = #tpu.dot_dimension_numbers<[1], [0], [0], [1], [0, 0, 1, 1], [], []>} : vector<8x32xbf16>, vector<32x64xbf16>, vector<8x64xf32> -> vector<8x64xf32>
    %10 = vector.extract_strided_slice %9 {offsets = [0, 0], sizes = [8, 16], strides = [1, 1]} : vector<8x64xf32> to vector<8x16xf32>
    %11 = vector.extract_strided_slice %9 {offsets = [0, 16], sizes = [8, 16], strides = [1, 1]} : vector<8x64xf32> to vector<8x16xf32>
    %12 = vector.extract_strided_slice %9 {offsets = [0, 32], sizes = [8, 16], strides = [1, 1]} : vector<8x64xf32> to vector<8x16xf32>
    %13 = vector.extract_strided_slice %9 {offsets = [0, 48], sizes = [8, 16], strides = [1, 1]} : vector<8x64xf32> to vector<8x16xf32>
    %14 = vector.shape_cast %10 : vector<8x16xf32> to vector<1x8x16xf32>
    %15 = vector.shape_cast %11 : vector<8x16xf32> to vector<1x8x16xf32>
    %16 = vector.shape_cast %12 : vector<8x16xf32> to vector<1x8x16xf32>
    %17 = vector.shape_cast %13 : vector<8x16xf32> to vector<1x8x16xf32>
    %18 = tpu.concatenate %14, %15, %16, %17 in 0 : vector<1x8x16xf32>, vector<1x8x16xf32>, vector<1x8x16xf32>, vector<1x8x16xf32> -> vector<4x8x16xf32>
    %19 = arith.truncf %18 : vector<4x8x16xf32> to vector<4x8x16xbf16>
    %c0_8 = arith.constant 0 : index
    %c0_9 = arith.constant 0 : index
    %c0_10 = arith.constant 0 : index
    %20 = vector.load %arg16[%c0_8, %c0_9, %c0_10] : memref<4x8x16xbf16, #tpu.memory_space<vmem>>, vector<4x8x16xbf16>
    "tpu.trace_start"() <{level = 10 : i32, message = "hqd,hkd->hqk"}> : () -> ()
    %cst_11 = arith.constant dense<0.000000e+00> : vector<4x8x8xf32>
    %21 = tpu.matmul %19, %20, %cst_11 {dimension_numbers = #tpu.dot_dimension_numbers<[2], [2], [1], [1], [0, 0, 0, 1, 1, 1], [0], [0]>} : vector<4x8x16xbf16>, vector<4x8x16xbf16>, vector<4x8x8xf32> -> vector<4x8x8xf32>
    "tpu.trace_stop"() : () -> ()
    %22 = vector.shape_cast %6 : vector<8x8xf32> to vector<1x8x8xf32>
    %cst_12 = arith.constant 0.000000e+00 : f32
    %23 = vector.broadcast %cst_12 : f32 to vector<1x8x8xf32>
    %24 = arith.cmpf one, %22, %23 : vector<1x8x8xf32>
    %cst_13 = arith.constant -1.000000e+09 : f32
    %25 = vector.shape_cast %24 : vector<1x8x8xi1> to vector<1x8x8xi1>
    %26 = vector.broadcast %25 : vector<1x8x8xi1> to vector<4x8x8xi1>
    %27 = vector.broadcast %cst_13 : f32 to vector<4x8x8xf32>
    %28 = arith.select %26, %27, %21 : vector<4x8x8xi1>, vector<4x8x8xf32>
    %cst_14 = arith.constant dense<0xFF800000> : vector<4x8xf32>
    %29 = vector.multi_reduction <maximumf>, %28, %cst_14 [2] : vector<4x8x8xf32> to vector<4x8xf32>
    %30 = vector.shape_cast %29 : vector<4x8xf32> to vector<4x8x1xf32>
    %31 = vector.broadcast %30 : vector<4x8x1xf32> to vector<4x8x8xf32>
    %32 = arith.subf %28, %31 : vector<4x8x8xf32>
    %33 = math.exp %32 : vector<4x8x8xf32>
    %cst_15 = arith.constant dense<0.000000e+00> : vector<4x8xf32>
    %34 = vector.multi_reduction <add>, %33, %cst_15 [2] : vector<4x8x8xf32> to vector<4x8xf32>
    %35 = vector.shape_cast %34 : vector<4x8xf32> to vector<4x8x1xf32>
    %36 = tpu.reciprocal %35 {approx = true} : vector<4x8x1xf32> -> vector<4x8x1xf32>
    %37 = vector.broadcast %36 : vector<4x8x1xf32> to vector<4x8x8xf32>
    %38 = arith.mulf %33, %37 : vector<4x8x8xf32>
    %c0_16 = arith.constant 0 : index
    %c0_17 = arith.constant 0 : index
    %c0_18 = arith.constant 0 : index
    %c0_19 = arith.constant 0 : index
    %39 = vector.load %arg15[%c0_16, %c0_17, %c0_18, %c0_19] : memref<1x4x8x8xf32, #tpu.memory_space<vmem>>, vector<1x4x8x8xf32>
    %40 = vector.shape_cast %39 : vector<1x4x8x8xf32> to vector<4x8x8xf32>
    %41 = vector.shape_cast %38 : vector<4x8x8xf32> to vector<1x4x8x8xf32>
    tpu.vector_store %arg15[%c0_16, %c0_17, %c0_18, %c0_19], %41 {strides = array<i32>} : memref<1x4x8x8xf32, #tpu.memory_space<vmem>>, vector<1x4x8x8xf32>,
    %42 = arith.truncf %38 : vector<4x8x8xf32> to vector<4x8x8xbf16>
    %c0_20 = arith.constant 0 : index
    %c0_21 = arith.constant 0 : index
    %c0_22 = arith.constant 0 : index
    %43 = vector.load %arg17[%c0_20, %c0_21, %c0_22] : memref<4x8x16xbf16, #tpu.memory_space<vmem>>, vector<4x8x16xbf16>
    "tpu.trace_start"() <{level = 10 : i32, message = "hqk,hkd->hqd"}> : () -> ()
    %cst_23 = arith.constant dense<0.000000e+00> : vector<4x8x16xf32>
    %44 = tpu.matmul %42, %43, %cst_23 {dimension_numbers = #tpu.dot_dimension_numbers<[2], [1], [1], [2], [0, 0, 0, 1, 1, 2], [0], [0]>} : vector<4x8x8xbf16>, vector<4x8x16xbf16>, vector<4x8x16xf32> -> vector<4x8x16xf32>
    "tpu.trace_stop"() : () -> ()
    %45 = arith.truncf %44 : vector<4x8x16xf32> to vector<4x8x16xbf16>
    %c0_24 = arith.constant 0 : index
    %c0_25 = arith.constant 0 : index
    %c0_26 = arith.constant 0 : index
    %46 = vector.load %arg7[%c0_24, %c0_25, %c0_26] : memref<4x16x32xbf16, #tpu.memory_space<vmem>>, vector<4x16x32xbf16>
    "tpu.trace_start"() <{level = 10 : i32, message = "hqd,hde->hqe"}> : () -> ()
    %cst_27 = arith.constant dense<0.000000e+00> : vector<4x8x32xf32>
    %47 = tpu.matmul %45, %46, %cst_27 {dimension_numbers = #tpu.dot_dimension_numbers<[2], [1], [1], [2], [0, 0, 0, 1, 1, 2], [0], [0]>} : vector<4x8x16xbf16>, vector<4x16x32xbf16>, vector<4x8x32xf32> -> vector<4x8x32xf32>
    "tpu.trace_stop"() : () -> ()
    %cst_28 = arith.constant dense<0.000000e+00> : vector<8x32xf32>
    %48 = vector.multi_reduction <add>, %47, %cst_28 [0] : vector<4x8x32xf32> to vector<8x32xf32>
    %49 = arith.addf %48, %4 : vector<8x32xf32>
    %c0_29 = arith.constant 0 : index
    %c0_30 = arith.constant 0 : index
    %50 = vector.load %arg8[%c0_29, %c0_30] : memref<1x32xf32, #tpu.memory_space<vmem>>, vector<1x32xf32>
    %c0_31 = arith.constant 0 : index
    %c0_32 = arith.constant 0 : index
    %51 = vector.load %arg9[%c0_31, %c0_32] : memref<1x32xf32, #tpu.memory_space<vmem>>, vector<1x32xf32>
    %cst_33 = arith.constant dense<0.000000e+00> : vector<8xf32>
    %52 = vector.multi_reduction <add>, %49, %cst_33 [1] : vector<8x32xf32> to vector<8xf32>
    %53 = vector.shape_cast %52 : vector<8xf32> to vector<8x1xf32>
    %cst_34 = arith.constant 3.200000e+01 : f32
    %54 = vector.broadcast %cst_34 : f32 to vector<8x1xf32>
    %55 = arith.divf %53, %54 : vector<8x1xf32>
    %56 = vector.broadcast %55 : vector<8x1xf32> to vector<8x32xf32>
    %57 = arith.subf %49, %56 : vector<8x32xf32>
    %58 = arith.mulf %57, %57 : vector<8x32xf32>
    %cst_35 = arith.constant dense<0.000000e+00> : vector<8xf32>
    %59 = vector.multi_reduction <add>, %58, %cst_35 [1] : vector<8x32xf32> to vector<8xf32>
    %60 = vector.shape_cast %59 : vector<8xf32> to vector<8x1xf32>
    %cst_36 = arith.constant 3.200000e+01 : f32
    %61 = vector.broadcast %cst_36 : f32 to vector<8x1xf32>
    %62 = arith.divf %60, %61 : vector<8x1xf32>
    %63 = vector.broadcast %55 : vector<8x1xf32> to vector<8x32xf32>
    %64 = arith.subf %49, %63 : vector<8x32xf32>
    %cst_37 = arith.constant 9.99999974E-6 : f32
    %65 = vector.broadcast %cst_37 : f32 to vector<8x1xf32>
    %66 = arith.addf %62, %65 : vector<8x1xf32>
    %67 = math.rsqrt %66 : vector<8x1xf32>
    %68 = vector.broadcast %67 : vector<8x1xf32> to vector<8x32xf32>
    %69 = arith.mulf %64, %68 : vector<8x32xf32>
    %70 = vector.broadcast %50 : vector<1x32xf32> to vector<8x32xf32>
    %71 = arith.mulf %69, %70 : vector<8x32xf32>
    %72 = vector.broadcast %51 : vector<1x32xf32> to vector<8x32xf32>
    %73 = arith.addf %71, %72 : vector<8x32xf32>
    %74 = arith.truncf %73 : vector<8x32xf32> to vector<8x32xbf16>
    %c0_38 = arith.constant 0 : index
    %c0_39 = arith.constant 0 : index
    %75 = vector.load %arg10[%c0_38, %c0_39] : memref<32x64xbf16, #tpu.memory_space<vmem>>, vector<32x64xbf16>
    %cst_40 = arith.constant dense<0.000000e+00> : vector<8x64xf32>
    %76 = tpu.matmul %74, %75, %cst_40 {dimension_numbers = #tpu.dot_dimension_numbers<[1], [0], [0], [1], [0, 0, 1, 1], [], []>} : vector<8x32xbf16>, vector<32x64xbf16>, vector<8x64xf32> -> vector<8x64xf32>
    %cst_41 = arith.constant 0.000000e+00 : f32
    %77 = vector.broadcast %cst_41 : f32 to vector<8x64xf32>
    %78 = arith.maximumf %76, %77 : vector<8x64xf32>
    %79 = arith.truncf %78 : vector<8x64xf32> to vector<8x64xbf16>
    %c0_42 = arith.constant 0 : index
    %c0_43 = arith.constant 0 : index
    %80 = vector.load %arg11[%c0_42, %c0_43] : memref<64x32xbf16, #tpu.memory_space<vmem>>, vector<64x32xbf16>
    %cst_44 = arith.constant dense<0.000000e+00> : vector<8x32xf32>
    %81 = tpu.matmul %79, %80, %cst_44 {dimension_numbers = #tpu.dot_dimension_numbers<[1], [0], [0], [1], [0, 0, 1, 1], [], []>} : vector<8x64xbf16>, vector<64x32xbf16>, vector<8x32xf32> -> vector<8x32xf32>
    %82 = arith.addf %81, %73 : vector<8x32xf32>
    %c0_45 = arith.constant 0 : index
    %c0_46 = arith.constant 0 : index
    %83 = vector.load %arg12[%c0_45, %c0_46] : memref<1x32xf32, #tpu.memory_space<vmem>>, vector<1x32xf32>
    %c0_47 = arith.constant 0 : index
    %c0_48 = arith.constant 0 : index
    %84 = vector.load %arg13[%c0_47, %c0_48] : memref<1x32xf32, #tpu.memory_space<vmem>>, vector<1x32xf32>
    %cst_49 = arith.constant dense<0.000000e+00> : vector<8xf32>
    %85 = vector.multi_reduction <add>, %82, %cst_49 [1] : vector<8x32xf32> to vector<8xf32>
    %86 = vector.shape_cast %85 : vector<8xf32> to vector<8x1xf32>
    %cst_50 = arith.constant 3.200000e+01 : f32
    %87 = vector.broadcast %cst_50 : f32 to vector<8x1xf32>
    %88 = arith.divf %86, %87 : vector<8x1xf32>
    %89 = vector.broadcast %88 : vector<8x1xf32> to vector<8x32xf32>
    %90 = arith.subf %82, %89 : vector<8x32xf32>
    %91 = arith.mulf %90, %90 : vector<8x32xf32>
    %cst_51 = arith.constant dense<0.000000e+00> : vector<8xf32>
    %92 = vector.multi_reduction <add>, %91, %cst_51 [1] : vector<8x32xf32> to vector<8xf32>
    %93 = vector.shape_cast %92 : vector<8xf32> to vector<8x1xf32>
    %cst_52 = arith.constant 3.200000e+01 : f32
    %94 = vector.broadcast %cst_52 : f32 to vector<8x1xf32>
    %95 = arith.divf %93, %94 : vector<8x1xf32>
    %96 = vector.broadcast %88 : vector<8x1xf32> to vector<8x32xf32>
    %97 = arith.subf %82, %96 : vector<8x32xf32>
    %cst_53 = arith.constant 9.99999974E-6 : f32
    %98 = vector.broadcast %cst_53 : f32 to vector<8x1xf32>
    %99 = arith.addf %95, %98 : vector<8x1xf32>
    %100 = math.rsqrt %99 : vector<8x1xf32>
    %101 = vector.broadcast %100 : vector<8x1xf32> to vector<8x32xf32>
    %102 = arith.mulf %97, %101 : vector<8x32xf32>
    %103 = vector.broadcast %83 : vector<1x32xf32> to vector<8x32xf32>
    %104 = arith.mulf %102, %103 : vector<8x32xf32>
    %105 = vector.broadcast %84 : vector<1x32xf32> to vector<8x32xf32>
    %106 = arith.addf %104, %105 : vector<8x32xf32>
    %c0_54 = arith.constant 0 : index
    %c0_55 = arith.constant 0 : index
    %c0_56 = arith.constant 0 : index
    %107 = vector.load %arg14[%c0_54, %c0_55, %c0_56] : memref<1x8x32xf32, #tpu.memory_space<vmem>>, vector<1x8x32xf32>
    %108 = vector.shape_cast %107 : vector<1x8x32xf32> to vector<8x32xf32>
    %109 = vector.shape_cast %106 : vector<8x32xf32> to vector<1x8x32xf32>
    tpu.vector_store %arg14[%c0_54, %c0_55, %c0_56], %109 {strides = array<i32>} : memref<1x8x32xf32, #tpu.memory_space<vmem>>, vector<1x8x32xf32>,
    return
  }
  func.func @transform_0(%arg0: i32, %arg1: i32) -> (i32, i32, i32) {
    %c0_i32 = arith.constant 0 : i32
    %c0_i32_0 = arith.constant 0 : i32
    return %arg0, %arg1, %c0_i32 : i32, i32, i32
  }
  func.func @transform_1(%arg0: i32, %arg1: i32) -> (i32, i32, i32) {
    %c0_i32 = arith.constant 0 : i32
    %c0_i32_0 = arith.constant 0 : i32
    %c0_i32_1 = arith.constant 0 : i32
    return %arg0, %c0_i32, %c0_i32_0 : i32, i32, i32
  }
  func.func @transform_2(%arg0: i32, %arg1: i32) -> (i32, i32, i32) {
    %c0_i32 = arith.constant 0 : i32
    %c0_i32_0 = arith.constant 0 : i32
    %c0_i32_1 = arith.constant 0 : i32
    return %c0_i32, %arg1, %c0_i32_0 : i32, i32, i32
  }
  func.func @transform_3(%arg0: i32, %arg1: i32) -> (i32, i32) {
    %c0_i32 = arith.constant 0 : i32
    %c0_i32_0 = arith.constant 0 : i32
    %c0_i32_1 = arith.constant 0 : i32
    return %c0_i32, %c0_i32_0 : i32, i32
  }
  func.func @transform_4(%arg0: i32, %arg1: i32) -> (i32, i32) {
    %c0_i32 = arith.constant 0 : i32
    %c0_i32_0 = arith.constant 0 : i32
    %c0_i32_1 = arith.constant 0 : i32
    return %c0_i32, %c0_i32_0 : i32, i32
  }
  func.func @transform_5(%arg0: i32, %arg1: i32) -> (i32, i32, i32) {
    %c0_i32 = arith.constant 0 : i32
    %c0_i32_0 = arith.constant 0 : i32
    %c0_i32_1 = arith.constant 0 : i32
    %c0_i32_2 = arith.constant 0 : i32
    return %c0_i32, %c0_i32_0, %c0_i32_1 : i32, i32, i32
  }
  func.func @transform_6(%arg0: i32, %arg1: i32) -> (i32, i32) {
    %c0_i32 = arith.constant 0 : i32
    %c0_i32_0 = arith.constant 0 : i32
    %c0_i32_1 = arith.constant 0 : i32
    return %c0_i32, %c0_i32_0 : i32, i32
  }
  func.func @transform_7(%arg0: i32, %arg1: i32) -> (i32, i32) {
    %c0_i32 = arith.constant 0 : i32
    %c0_i32_0 = arith.constant 0 : i32
    %c0_i32_1 = arith.constant 0 : i32
    return %c0_i32, %c0_i32_0 : i32, i32
  }
  func.func @transform_8(%arg0: i32, %arg1: i32) -> (i32, i32) {
    %c0_i32 = arith.constant 0 : i32
    %c0_i32_0 = arith.constant 0 : i32
    %c0_i32_1 = arith.constant 0 : i32
    return %c0_i32, %c0_i32_0 : i32, i32
  }
  func.func @transform_9(%arg0: i32, %arg1: i32) -> (i32, i32) {
    %c0_i32 = arith.constant 0 : i32
    %c0_i32_0 = arith.constant 0 : i32
    %c0_i32_1 = arith.constant 0 : i32
    return %c0_i32, %c0_i32_0 : i32, i32
  }
  func.func @transform_10(%arg0: i32, %arg1: i32) -> (i32, i32) {
    %c0_i32 = arith.constant 0 : i32
    %c0_i32_0 = arith.constant 0 : i32
    %c0_i32_1 = arith.constant 0 : i32
    return %c0_i32, %c0_i32_0 : i32, i32
  }
  func.func @transform_11(%arg0: i32, %arg1: i32) -> (i32, i32) {
    %c0_i32 = arith.constant 0 : i32
    %c0_i32_0 = arith.constant 0 : i32
    %c0_i32_1 = arith.constant 0 : i32
    return %c0_i32, %c0_i32_0 : i32, i32
  }
  func.func @transform_12(%arg0: i32, %arg1: i32) -> (i32, i32, i32) {
    %c0_i32 = arith.constant 0 : i32
    %c0_i32_0 = arith.constant 0 : i32
    return %arg0, %arg1, %c0_i32 : i32, i32, i32
  }
  func.func @transform_13(%arg0: i32, %arg1: i32) -> (i32, i32, i32, i32) {
    %c0_i32 = arith.constant 0 : i32
    %c0_i32_0 = arith.constant 0 : i32
    %c0_i32_1 = arith.constant 0 : i32
    return %arg0, %c0_i32, %arg1, %c0_i32_0 : i32, i32, i32, i32
  }
}

</mosaic_0001>

<bundles_post_ra>
// kernel: tpu_custom_call.1
= control target key start
LH: loop header
LB: loop body
LE: loop exit
PB: predicated region body
PF: predicated region fallthrough
CT: control target
= control target key end

     0   :  { %s3011_s0 = inlined_call_operand.vmem [shape: f32[2,8,32], index: 0, kind: input, shape index: {}]   ;;  %s3012_s1 = inlined_call_operand.hbm [shape: f32[2,8,32], index: 1, kind: input, shape index: {}]   ;;  %s3013_s2 = inlined_call_operand.vmem [shape: f32[1,8,8], index: 2, kind: input, shape index: {}]   ;;  %s3014_s3 = inlined_call_operand.hbm [shape: bf16[32,64], index: 3, kind: input, shape index: {}]   ;;  %s3015_s4 = inlined_call_operand.hbm [shape: bf16[32,128], index: 4, kind: input, shape index: {}]   ;;  %s3016_s5 = inlined_call_operand.vmem [shape: bf16[4,16,32], index: 5, kind: input, shape index: {}]   ;;  %s3017_s6 = inlined_call_operand.vmem [shape: f32[1,32], index: 6, kind: input, shape index: {}]   ;;  %s3018_s7 = inlined_call_operand.vmem [shape: f32[1,32], index: 7, kind: input, shape index: {}]   ;;  %s3019_s8 = inlined_call_operand.hbm [shape: bf16[32,64], index: 8, kind: input, shape index: {}]   ;;  %s3020_s9 = inlined_call_operand.vmem [shape: bf16[64,32], index: 9, kind: input, shape index: {}]   ;;  %s3021_s10 = inlined_call_operand.vmem [shape: f32[1,32], index: 10, kind: input, shape index: {}]   ;;  %s3022_s11 = inlined_call_operand.vmem [shape: f32[1,32], index: 11, kind: input, shape index: {}]   ;;  %s3023_s12 = inlined_call_operand.hbm [shape: f32[2,8,32], index: 12, kind: output, shape index: {0}]   ;;  %s3024_s13 = inlined_call_operand.hbm [shape: f32[2,4,8,8], index: 13, kind: output, shape index: {1}]  }
   0x1   :  { %3035 = sst [smem:[#allocation22_spill]] %s3011_s0 }
   0x2   :  { %3036 = sst [smem:[#allocation23_spill]] %s3016_s5 }
   0x3   :  { %3037 = sst [smem:[#allocation24_spill]] %s3017_s6 }
   0x4   :  { %3038 = sst [smem:[#allocation25_spill]] %s3018_s7 }
   0x5   :  { %3039 = sst [smem:[#allocation26_spill]] %s3020_s9 }
   0x6   :  { %3040 = sst [smem:[#allocation27_spill]] %s3021_s10 }
   0x7   :  { %3041 = sst [smem:[#allocation28_spill]] %s3022_s11 }
   0x8   :  { %3042 = sst [smem:[#allocation29_spill]] %s3023_s12 }
   0x9   :  { %3043 = sst [smem:[#allocation30_spill]] %s3024_s13 }
   0xa   :  { %19 = vsyncpa [#allocation5], 0 }
   0xb   :  { %21 = vsyncpa [#allocation5 + $0x1], 0 }
   0xc   :  { %22 = vsyncpa [#allocation8], 0 }
   0xd   :  { %23 = vsyncpa [#allocation11], 0 }
   0xe   :  { %24 = vsyncpa [#allocation6], 0 }
   0xf   :  { %26 = vsyncpa [#allocation6 + $0x1], 0 }
  0x10   :  { %27 = vsyncpa [#allocation14], 0 }
  0x11   :  { %29 = vsyncpa [#allocation14 + $0x1], 0  ;;  %s2504_s25 = smov 0   ;;  %s2506_s26 = smov 0  }
  0x12   :  { %s2508_s27 = smov 0   ;;  %s2510_s28 = smov 0  }
  0x13   :  { %s2512_s29 = smov 0   ;;  %s2514_s30 = smov 0  }
  0x14 LB: > { %3044 = sst [smem:[#allocation20_spill]] %s2396_s25  ;;  %s1824_s14 = sadd.s32 4294967295, %s2416_s30   ;;  %s2416_s30 = sphi %s2514_s30, %s35_s30   ;;  %s2412_s29 = sphi %s2512_s29, %s3076_s29   ;;  %s2408_s28 = sphi %s2510_s28, %s3075_s28   ;;  %s2404_s27 = sphi %s2508_s27, %s3074_s27   ;;  %s2400_s26 = sphi %s2506_s26, %s3073_s26   ;;  %s2396_s25 = sphi %s2504_s25, %s3072_s25  }
  0x15   : > { %s1825_s15 = sadd.s32 4294967294, %s2416_s30   ;;  %p95_p0 = scmp.ne.s32.totalorder %s2400_s26, %s2396_s25 }
  0x16   : > { %p2538_p1 = scmp.eq.s32.totalorder %s1824_s14, 0  ;;  %p2542_p2 = scmp.eq.s32.totalorder %s1824_s14, 1 }
  0x17   : > { %p342_p3 = scmp.eq.s32.totalorder %s1825_s15, 1  ;;  %p1826_p5 = scmp.ge.s32.totalorder %s2416_s30, 1 }
  0x18   : > { %s3045_s16 = scalar_select %p2538_p1, 1, 0 }
  0x19   : > { %s3046_s17 = scalar_select %p2542_p2, 1, 0 }
  0x1a   : > { %p2548_p4 = por %p2538_p1, %p95_p0  ;;  %p2553_p6 = por %p342_p3, %p95_p0 }
  0x1b   : > { %p377_p7 = scmp.lt.s32.totalorder %s2416_s30, 3  ;;  %s2418_s21 = smov [#allocation7]  }
  0x1c   : > { %s3047_s18 = scalar_select %p2548_p4, 1, 0 }
  0x1d   : > { %s3048_s19 = scalar_select %p2553_p6, 1, 0 }
  0x1e   : > { %p2558_p8 = pnand %p1826_p5, %p377_p7  ;;  %s396_s22 = sshll.u32 %s2418_s21, 4  ;;  %s2562_s22 = int_to_ptr.vmem [resolvable:$true] %s396_s22 }
  0x1f   : > { %3049 = sst [smem:[#allocation21_spill]] %s3048_s19  ;;  %s2419_s24 = smov [#allocation9]  }
  0x20   : > { %s3050_s20 = scalar_select %p2558_p8, 1, 0 }
  0x21   : > { %p2056_p9 = pneg %p2558_p8  ;;  %s409_s14 = sshll.u32 %s2419_s24, 4  ;;  %s2573_s14 = int_to_ptr.vmem [resolvable:$true] %s409_s14 }
  0x22   : > { %s2420_s15 = smov [#allocation10]   ;;  %s2180_s12 = scalar_lea.hbm %s3014_s3, 256 }
  0x23   : > { %p2569_p11 = pnand %p2056_p9, %p2538_p1  ;;  %s2575_s19 = sshll.u32 %s2420_s15, 4  ;;  %s432_s19 = int_to_ptr.vmem [resolvable:$true] %s2575_s19 }
  0x24   : > { %p2181_p12 = scmp.ne.s32.totalorder %s3014_s3, %s2180_s12  ;;  %p2187_p5 = scmp.lt.u32.totalorder %s2180_s12, %s3014_s3 }
  0x25   : > { %p2585_p13 = pneg %p2569_p11 }
  0x27   : > { %p2183_p0 = pnand %p2585_p13, %p2181_p12 }
  0x29   : > { %p2184_p3 = pneg %p2183_p0 }
  0x2b   : > { %p2189_p7 = pnand %p2187_p5, %p2184_p3 }
  0x2d   : > { %2192 = shalt.err (!%p2189_p7)
}
  0x2e   : > { %s2193_s10 = scalar_lea.vmem %s2562_s22, 256  ;;  %p2201_p1 = scmp.lt.s32.totalorder %s2562_s22, %s2562_s22 }
  0x2f   : > { %p2194_p9 = scmp.ne.s32.totalorder %s2562_s22, %s2193_s10  ;;  %p2202_p4 = scmp.lt.s32.totalorder %s2193_s10, %s2193_s10 }
  0x31   : > { %p2196_p10 = pnand %p2194_p9, %p2585_p13  ;;  %p2203_p12 = por %p2202_p4, %p2201_p1 }
  0x33   : > { %p2197_p6 = pneg %p2196_p10 }
  0x35   : > { %p2204_p0 = pnand %p2203_p12, %p2197_p6 }
  0x37   : > { %2207 = shalt.err (!%p2204_p0)
}
  0x38   : > { %s2421_s11 = smov 64   ;;  %s2422_s12 = smov 4  }
  0x39   : > { %2059 = dma.hbm_to_vmem [thread:$0]  (!%p2569_p11), %s3014_s3, 256, %s2562_s22, [#allocation8], %s2421_s11, %s2421_s11, %s2422_s12  }
  0x3a   : > { %s2208_s10 = scalar_lea.hbm %s3015_s4, 256 }
  0x3b   : > { %p2209_p1 = scmp.ne.s32.totalorder %s3015_s4, %s2208_s10  ;;  %p2215_p10 = scmp.lt.u32.totalorder %s2208_s10, %s3015_s4 }
  0x3d   : > { %p2211_p4 = pnand %p2209_p1, %p2585_p13 }
  0x3f   : > { %p2212_p6 = pneg %p2211_p4 }
  0x41   : > { %p2217_p3 = pnand %p2215_p10, %p2212_p6 }
  0x43   : > { %2220 = shalt.err (!%p2217_p3)
}
  0x44   : > { %s2221_s22 = scalar_lea.vmem %s2573_s14, 256  ;;  %p2229_p12 = scmp.lt.s32.totalorder %s2573_s14, %s2573_s14 }
  0x45   : > { %p2222_p5 = scmp.ne.s32.totalorder %s2573_s14, %s2221_s22  ;;  %p2230_p0 = scmp.lt.s32.totalorder %s2221_s22, %s2221_s22 }
  0x47   : > { %p2224_p7 = pnand %p2222_p5, %p2585_p13  ;;  %p2231_p1 = por %p2230_p0, %p2229_p12 }
  0x49   : > { %p2225_p9 = pneg %p2224_p7 }
  0x4b   : > { %p2232_p4 = pnand %p2231_p1, %p2225_p9 }
  0x4d   : > { %2235 = shalt.err (!%p2232_p4)
}
  0x4e   : > { %2062 = dma.hbm_to_vmem [thread:$0]  (!%p2569_p11), %s3015_s4, 256, %s2573_s14, [#allocation8], %s2421_s11, %s2421_s11, %s2422_s12  }
  0x4f   : > { %s2236_s25 = scalar_lea.hbm %s3019_s8, 256 }
  0x50   : > { %p2237_p6 = scmp.ne.s32.totalorder %s3019_s8, %s2236_s25  ;;  %p2243_p5 = scmp.lt.u32.totalorder %s2236_s25, %s3019_s8 }
  0x52   : > { %p2239_p10 = pnand %p2237_p6, %p2585_p13 }
  0x54   : > { %p2240_p3 = pneg %p2239_p10 }
  0x56   : > { %p2245_p7 = pnand %p2243_p5, %p2240_p3 }
  0x58   : > { %2248 = shalt.err (!%p2245_p7)
}
  0x59   : > { %s2249_s22 = scalar_lea.vmem %s432_s19, 256  ;;  %p2257_p1 = scmp.lt.s32.totalorder %s432_s19, %s432_s19 }
  0x5a   : > { %p2250_p9 = scmp.ne.s32.totalorder %s432_s19, %s2249_s22  ;;  %p2258_p4 = scmp.lt.s32.totalorder %s2249_s22, %s2249_s22 }
  0x5c   : > { %p2252_p12 = pnand %p2250_p9, %p2585_p13  ;;  %p2259_p8 = por %p2258_p4, %p2257_p1 }
  0x5e   : > { %p2253_p0 = pneg %p2252_p12 }
  0x60   : > { %p2260_p2 = pnand %p2259_p8, %p2253_p0 }
  0x62   : > { %2263 = shalt.err (!%p2260_p2)
}
  0x63   : > { %2065 = dma.hbm_to_vmem [thread:$0]  (!%p2569_p11), %s3019_s8, 256, %s432_s19, [#allocation11], %s2421_s11, %s2421_s11, %s2422_s12  }
  0x64   : > { %s82_s13 = sadd.s32 1, %s2404_s27  ;;  %s47_s23 = sadd.s32 1, %s2412_s29 }
  0x65   : > { %p89_p2 = scmp.ne.s32.totalorder %s2404_s27, %s2400_s26  ;;  %p49_p8 = scmp.ge.s32.totalorder %s47_s23, 2 }
  0x66   : > { %p90_p13 = scmp.eq.s32.totalorder %s2416_s30, 0  ;;  %p3053_p6 = scmp.ne.s32.totalorder %s3046_s17, 0 }
  0x67   : > { %p2080_p3 = scmp.lt.s32.totalorder %s2416_s30, 2  ;;  %s3078_s23 = smov (%p49_p8, %s47_s23), 0 }
  0x68   : > { %p2664_p10 = por %p3053_p6, %p89_p2  ;;  %p91_p5 = por %p90_p13, %p89_p2 }
  0x69   : > { %s464_s7 = sand.u32 1, %s2404_s27   ;;  %s79_s9 = ssub.s32 %s2412_s29, %s3078_s23 }
  0x6a   : > { %p80_p7 = scmp.eq.s32.totalorder %s79_s9, 0  ;;  %s1832_s19 = sshll.u32 %s464_s7, 3 }
  0x6b   : > { %s1833_s11 = sshll.u32 %s2412_s29, 7  ;;  %s468_s24 = scalar_lea.vmem [#allocation4], %s1832_s19 }
  0x6c   : > { %s2676_s12 = scalar_select %p80_p7, %s2404_s27, %s82_s13  }
  0x6d   : > { %s2681_s17 = scalar_lea.hbm %s3012_s1, %s1833_s11  ;;  %s475_s15 = sshll.u32 %s468_s24, 4  ;;  %s2683_s15 = int_to_ptr.vmem [resolvable:$true] %s475_s15 }
  0x6e   : > { %p2687_p11 = pnand %p2080_p3, %p91_p5  ;;  %s465_s22 = scalar_lea.sflag [#allocation5], %s464_s7 }
  0x6f   : > { %s2264_s14 = scalar_lea.hbm %s2681_s17, 128  ;;  %s2269_s9 = scalar_lea.hbm %s3012_s1, 256 }
  0x70   : > { %p2265_p9 = scmp.ne.s32.totalorder %s2681_s17, %s2264_s14  ;;  %p2266_p12 = pneg %p2687_p11 }
  0x71   : > { %p2270_p4 = scmp.lt.u32.totalorder %s2681_s17, %s3012_s1  ;;  %p2271_p2 = scmp.lt.u32.totalorder %s2269_s9, %s2264_s14 }
  0x72   : > { %p2267_p0 = pnand %p2266_p12, %p2265_p9  ;;  %p2273_p13 = scmp.lt.u32.totalorder %s2264_s14, %s2681_s17 }
  0x73   : > { %p2272_p8 = por %p2271_p2, %p2270_p4 }
  0x74   : > { %p2268_p1 = pneg %p2267_p0 }
  0x75   : > { %p2274_p6 = por %p2273_p13, %p2272_p8 }
  0x77   : > { %p2275_p3 = pnand %p2274_p6, %p2268_p1 }
  0x79   : > { %2278 = shalt.err (!%p2275_p3)
}
  0x7a   : > { %s2279_s7 = scalar_lea.vmem %s2683_s15, 128  ;;  %s2423_s25 = smov [#allocation4]  }
  0x7b   : > { %p2280_p5 = scmp.ne.s32.totalorder %s2683_s15, %s2279_s7  ;;  %s2284_s21 = sshll.u32 %s2423_s25, 4  ;;  %s2285_s21 = int_to_ptr.vmem [resolvable:$false] %s2284_s21 }
  0x7c   : > { %s2286_s24 = scalar_lea.vmem %s2285_s21, 256  ;;  %p2287_p0 = scmp.lt.s32.totalorder %s2683_s15, %s2285_s21 }
  0x7d   : > { %p2282_p7 = pnand %p2280_p5, %p2266_p12  ;;  %p2288_p4 = scmp.lt.s32.totalorder %s2286_s24, %s2279_s7 }
  0x7f   : > { %p2283_p9 = pneg %p2282_p7  ;;  %p2289_p2 = por %p2288_p4, %p2287_p0 }
  0x81   : > { %p2290_p8 = pnand %p2289_p2, %p2283_p9 }
  0x83   : > { %2293 = shalt.err (!%p2290_p8)
}
  0x84   : > { %2069 = dma.hbm_to_vmem [thread:$0]  (!%p2687_p11), %s2681_s17, 128, %s2683_s15, %s465_s22  }
  0x85   : > { %p3056_p1 = scmp.ne.s32.totalorder %s3050_s20, 0 }
  0x86   : > { %s2719_s14 = sand.u32 (!%p3056_p1), 1, %s2400_s26   ;;  %p3057_p12 = scmp.ne.s32.totalorder (!%p3056_p1), %s3047_s18, 0 }
  0x87   : > { %484 = sbr.rel (%p3056_p1) target bundleno = 2552 (0x9f8), region = 68  ;;  %s1835_s5 = sshll.u32 (!%p3056_p1), %s2719_s14, 3 }
  0x88   : > { %s487_s13 = scalar_lea.sflag (!%p3056_p1), [#allocation5], %s2719_s14  ;;  %s490_s9 = scalar_lea.vmem (!%p3056_p1), [#allocation4], %s1835_s5 }
  0x8e   : > { %2375 = dma.done.wait (%p3057_p12), %s487_s13, 128  }
  0x8f   : > { %2377 = vsyncadd (%p3057_p12), %s487_s13, 4294967168  ;;  %p3058_p11 = scmp.ne.s32.totalorder %s3045_s16, 0 }
  0x91   : > { %2379 = dma.done.wait (%p3058_p11), [#allocation8], 512  }
  0x92   : > { %2381 = vsyncadd (%p3058_p11), [#allocation8], 4294966784 }
  0x93   : > { %2383 = dma.done.wait (%p3058_p11), [#allocation11], 256  }
  0x94   : > { %2385 = vsyncadd (%p3058_p11), [#allocation11], 4294967040  ;;  %p561_p13 = scmp.lt.s32.totalorder %s2408_s28, 1  ;;  %v2424_v0 = vmov 0.0   ;;  %vm2425_vm0 = vmmov 0   ;;  %v2146_v1 = vld [vmem:[#allocation9] sm:$0xff]  }
  0x95   : > { %1930 = vmatprep.subr.bf16.mxu0 %v2424_v0  ;;  %1934 = vmatprep.mubr.msk.bf16.mxu0 %vm2425_vm0, %v2424_v0  ;;  %v2147_v2 = vld [vmem:[#allocation9 + $0x8] sm:$0xff]   ;;  %s3059_s0 = sld [smem:[#allocation22_spill]]  ;;  %v2148_v4 = vld [vmem:[#allocation7] sm:$0xff]   ;;  %vm595_vm1 = vcmask 261120   ;;  %v2149_v5 = vld [vmem:[#allocation7 + $0x8] sm:$0xff]   ;;  %vm653_vm2 = vcmask 125952  }
  0x96   : > { %1938 = vmatprep.subr.bf16.mxu1 %v2424_v0  ;;  %1942 = vmatprep.mubr.msk.bf16.mxu1 %vm2425_vm0, %v2424_v0  ;;  %s562_s18 = scalar_select %p561_p13, %s2408_s28, 1  ;;  %v577_v3 = vld [vmem:[%s490_s9] sm:$0xff]  ;;  %vm767_vm3 = vcmask 130048   ;;  %vm959_vm5 = vcmask 64512   ;;  %vm1019_vm6 = vcmask 1043456   ;;  %vm1541_vm7 = vcmask 523264  }
  0x97   : > { %1931 = vmatpush3.bf16.msra.mxu0 %v2146_v1  ;;  %v578_v7 = vpack.c.bf16 %v577_v3, %v577_v3  ;;  %1939 = vmatpush3.bf16.msra.mxu1 %v2148_v4  ;;  %s2426_s10 = smov 80   ;;  %s2427_s22 = smov 112   ;;  %v687_v39 = vld [vmem:[%s3013_s2] sm:$0xff] }
  0x98   : > { %s1841_s20 = sshll.u32 %s562_s18, 3  ;;  %1932 = vmatprep.subr.bf16.mxu0 %v2424_v0  ;;  %1940 = vmatprep.subr.bf16.mxu1 %v2424_v0  ;;  %s2428_s19 = smov 96   ;;  %vm952_vm4 = vcmp.ne.f32.partialorder %v687_v39, 0.0 }
  0x99   : > { %s2429_s25 = smov 64   ;;  %s1840_s21 = sshll.u32 %s2719_s14, 5 }
  0x9a   : > { %s2825_s24 = scalar_lea.vmem [#allocation13], %s1840_s21  ;;  %s3060_s18 = sld [smem:[#allocation23_spill]] }
  0x9b   : > { %s567_s15 = scalar_lea.vmem %s3059_s0, %s1841_s20  ;;  %1933 = vmatpush3.bf16.msra.mxu0 %v2147_v2  ;;  %1941 = vmatpush3.bf16.msra.mxu1 %v2149_v5  ;;  %s3061_s7 = sld [smem:[#allocation26_spill]] }
  0x9c   : > { %v2749_v6 = vld [vmem:[%s567_s15] sm:$0xff]  ;;  %1946 = vmatprep.subr.bf16.mxu0 %v2424_v0  ;;  %1952 = vmatprep.subr.bf16.mxu1 %v2424_v0  ;;  %s3062_s17 = sld [smem:[#allocation24_spill]]  ;;  %s1649_s21 = sshll.u32 %s2825_s24, 4  ;;  %s2923_s21 = int_to_ptr.vmem [resolvable:$true] %s1649_s21 }
  0x9d   : > { %v688_v8 = vpack.c.bf16 %v2749_v6, %v2749_v6  ;;  %s3064_s20 = sld [smem:[#allocation30_spill]]  ;;  %s2294_s15 = scalar_lea.vmem %s2923_s21, 512 }
  0x9e   : > { %1935 = vmatmul.mubr.msk.bf16.vlgmr.msra.gmra.mrb[0].mxu0 %vm595_vm1, %v578_v7  ;;  %p2295_p6 = scmp.ne.s32.totalorder %s2923_s21, %s2294_s15 }
  0x9f   : > { %1948 = vmatprep.mubr.msk.bf16.mxu0 %vm2425_vm0, %v2424_v0  ;;  %1943 = vmatmul.mubr.msk.bf16.vlgmr.msra.gmra.mrb[0].mxu1 %vm595_vm1, %v688_v8 }
  0xa0   : > { %1954 = vmatprep.mubr.msk.bf16.mxu1 %vm2425_vm0, %v2424_v0  ;;  %p2296_p3 = pnand %p2295_p6, %p2664_p10 }
  0xa2   : > { %p2297_p5 = pneg %p2296_p3 }
 0x171   : > { %v633_v9 = vpop.f32.mrb[0].mxu0 }
 0x172   : > { %v2762_v10 = vpack.c.bf16 %v633_v9, %v633_v9  ;;  %646 = vrot.lane.b32.xlu1 %v633_v9, %s2426_s10  ;;  %640 = vrot.lane.b32.xlu0 %v633_v9, %s2427_s22  ;;  %v1936_v11 = vpop.f32.mrb[1].mxu0  ;;  %v743_v14 = vpop.f32.mrb[0].mxu1 }
 0x173   : > { %v636_v12 = vpop.f32.mrb[2].mxu0  ;;  %v1944_v15 = vpop.f32.mrb[1].mxu1  ;;  %v759_v20 = vpack.c.bf16 %v743_v14, %v743_v14 }
 0x174   : > { %654 = vst.msk [vmem:[#allocation2] sm:$0xf] %vm653_vm2, %v2762_v10  ;;  %v1937_v13 = vpop.f32.mrb[3].mxu0  ;;  %v746_v16 = vpop.f32.mrb[2].mxu1 }
 0x175   : > { %v1945_v17 = vpop.f32.mrb[3].mxu1 }
 0x176   : > { %643 = vrot.lane.b32.xlu0 %v633_v9, %s2428_s19  ;;  %750 = vrot.lane.b32.xlu1 %v743_v14, %s2427_s22  ;;  %s3063_s22 = sld [smem:[#allocation25_spill]] }
 0x17a   : > { %756 = vrot.lane.b32.xlu1 %v743_v14, %s2426_s10  ;;  %753 = vrot.lane.b32.xlu0 %v743_v14, %s2428_s19  ;;  %s2430_s10 = smov [#allocation13]  }
 0x17b   : > { %v763_v18 = vld [vmem:[#allocation2] sm:$0xf] }
 0x17c   : > { %v772_v19 = vsel %vm767_vm3, %v763_v18, 0 }
 0x17d   : > { %1947 = vmatpush3.bf16.xpose.msra.mxu0 %v772_v19 }
 0x17e   : > { %1958 = vmatprep.subr.bf16.mxu0 %v2424_v0 }
 0x184   : > { %1949 = vmatmul.mubr.msk.bf16.vlgmr.msra.gmra.mrb[4].mxu0 %vm767_vm3, %v759_v20 }
 0x185   : > { %1960 = vmatprep.mubr.msk.bf16.mxu0 %vm2425_vm0, %v2424_v0 }
 0x1e4   : > { %v647_v21 = vpop.permute.xlu1 %646  ;;  %v641_v22 = vpop.permute.xlu0 %640 }
 0x1e5   : > { %v2771_v23 = vpack.c.bf16 %v647_v21, %v647_v21  ;;  %v2773_v24 = vpack.c.bf16 %v641_v22, %v641_v22 }
 0x1e7   : > { %657 = vst.msk [vmem:[#allocation2 + $0xc] sm:$0xf] %vm653_vm2, %v2771_v23  ;;  %655 = vst.msk [vmem:[#allocation2 + $0x4] sm:$0xf] %vm653_vm2, %v2773_v24 }
 0x1e8   : > { %v644_v25 = vpop.permute.xlu0 %643  ;;  %v751_v29 = vpop.permute.xlu1 %750 }
 0x1e9   : > { %v2779_v26 = vpack.c.bf16 %v644_v25, %v644_v25  ;;  %v760_v31 = vpack.c.bf16 %v751_v29, %v751_v29 }
 0x1eb   : > { %656 = vst.msk [vmem:[#allocation2 + $0x8] sm:$0xf] %vm653_vm2, %v2779_v26 }
 0x1ec   : > { %v754_v34 = vpop.permute.xlu0 %753  ;;  %v757_v37 = vpop.permute.xlu1 %756 }
 0x1ed   : > { %v761_v36 = vpack.c.bf16 %v754_v34, %v754_v34  ;;  %v762_v38 = vpack.c.bf16 %v757_v37, %v757_v37 }
 0x1ee   : > { %v764_v27 = vld [vmem:[#allocation2 + $0x4] sm:$0xf]  ;;  %v766_v33 = vld [vmem:[#allocation2 + $0xc] sm:$0xf] }
 0x1ef   : > { %v818_v28 = vsel %vm767_vm3, %v764_v27, 0  ;;  %v910_v35 = vsel %vm767_vm3, %v766_v33, 0 }
 0x1f0   : > { %1953 = vmatpush3.bf16.xpose.msra.mxu1 %v818_v28 }
 0x1f1   : > { %1964 = vmatprep.subr.bf16.mxu1 %v2424_v0 }
 0x1f2   : > { %v765_v30 = vld [vmem:[#allocation2 + $0x8] sm:$0xf] }
 0x1f3   : > { %v864_v32 = vsel %vm767_vm3, %v765_v30, 0 }
 0x1f4   : > { %1959 = vmatpush3.bf16.xpose.msra.mxu0 %v864_v32 }
 0x1f5   : > { %1970 = vmatprep.subr.bf16.mxu0 %v2424_v0 }
 0x1f7   : > { %1955 = vmatmul.mubr.msk.bf16.vlgmr.msra.gmra.mrb[4].mxu1 %vm767_vm3, %v760_v31 }
 0x1f8   : > { %1965 = vmatpush3.bf16.xpose.msra.mxu1 %v910_v35  ;;  %1966 = vmatprep.mubr.msk.bf16.mxu1 %vm2425_vm0, %v2424_v0 }
 0x1f9   : > { %1976 = vmatprep.subr.bf16.mxu1 %v2424_v0 }
 0x1fb   : > { %1961 = vmatmul.mubr.msk.bf16.vlgmr.msra.gmra.mrb[8].mxu0 %vm767_vm3, %v761_v36 }
 0x1fc   : > { %1972 = vmatprep.mubr.msk.bf16.mxu0 %vm2425_vm0, %v2424_v0 }
 0x1ff   : > { %1967 = vmatmul.mubr.msk.bf16.vlgmr.msra.gmra.mrb[8].mxu1 %vm767_vm3, %v762_v38 }
 0x200   : > { %1978 = vmatprep.mubr.msk.bf16.mxu1 %vm2425_vm0, %v2424_v0 }
 0x257   : > { %v808_v40 = vpop.f32.mrb[4].mxu0 }
 0x258   : > { %v955_v41 = vsel %vm952_vm4, -1e+09, %v808_v40  ;;  %v1950_v42 = vpop.f32.mrb[5].mxu0 }
 0x259   : > { %v811_v43 = vpop.f32.mrb[6].mxu0  ;;  %v960_v44 = vsel %vm959_vm5, %v955_v41, -inf  ;;  %v2150_v42 = vld [vmem:[%s3060_s18] sm:$0xff]  }
 0x25a   : > { %961 = vmax.xlane.f32.xlu0 %v960_v44  ;;  %v1951_v45 = vpop.f32.mrb[7].mxu0 }
 0x2ca   : > { %v854_v46 = vpop.f32.mrb[4].mxu1 }
 0x2cb   : > { %v956_v47 = vsel %vm952_vm4, -1e+09, %v854_v46  ;;  %v1956_v48 = vpop.f32.mrb[5].mxu1 }
 0x2cc   : > { %v857_v49 = vpop.f32.mrb[6].mxu1  ;;  %v963_v50 = vsel %vm959_vm5, %v956_v47, -inf }
 0x2cd   : > { %964 = vmax.xlane.f32.xlu1 %v963_v50  ;;  %v1957_v51 = vpop.f32.mrb[7].mxu1 }
 0x2ce   : > { %v900_v52 = vpop.f32.mrb[8].mxu0  ;;  %v2152_v51 = vld [vmem:[%s3060_s18 + $0x8] sm:$0xff]  }
 0x2cf   : > { %v957_v53 = vsel %vm952_vm4, -1e+09, %v900_v52  ;;  %v1962_v54 = vpop.f32.mrb[9].mxu0 }
 0x2d0   : > { %v903_v55 = vpop.f32.mrb[10].mxu0  ;;  %v966_v56 = vsel %vm959_vm5, %v957_v53, -inf }
 0x2d1   : > { %967 = vmax.xlane.f32.xlu0 %v966_v56  ;;  %v1963_v57 = vpop.f32.mrb[11].mxu0 }
 0x2d2   : > { %v946_v58 = vpop.f32.mrb[8].mxu1 }
 0x2d3   : > { %v958_v59 = vsel %vm952_vm4, -1e+09, %v946_v58  ;;  %v1968_v60 = vpop.f32.mrb[9].mxu1 }
 0x2d4   : > { %v949_v61 = vpop.f32.mrb[10].mxu1  ;;  %v969_v62 = vsel %vm959_vm5, %v958_v59, -inf }
 0x2d5   : > { %v1969_v63 = vpop.f32.mrb[11].mxu1  ;;  %970 = vmax.xlane.f32.xlu0 %v969_v62 }
 0x2de   : > { %670 = vrot.lane.b32.xlu1 %v2762_v10, %s2429_s25 }
 0x2e7   : > { %v962_v1 = vpop.xlane.xlu0 %961 }
 0x2e8   : > { %v972_v2 = vsub.f32 %v955_v41, %v962_v1  ;;  %v2153_v1 = vld [vmem:[%s3060_s18 + $0x18] sm:$0xff]  }
 0x2ea   : > { %v976_v3 = vmul.f32 1.442695, %v972_v2 }
 0x2ec   : > { %2160 = vpow2.f32 %v976_v3 }
 0x2f6   : > { %v2161_v4 = vpop.eup %2160 }
 0x2f7   : > { %v984_v5 = vsel %vm959_vm5, %v2161_v4, 0.0 }
 0x302   : > { %985 = vadd.xlane.f32.xlu1 %v984_v5 }
 0x35a   : > { %v965_v7 = vpop.xlane.xlu1 %964 }
 0x35b   : > { %v973_v8 = vsub.f32 %v956_v47, %v965_v7 }
 0x35d   : > { %v978_v9 = vmul.f32 1.442695, %v973_v8 }
 0x35e   : > { %v671_v11 = vpop.permute.xlu1 %670  ;;  %v968_v12 = vpop.xlane.xlu0 %967 }
 0x35f   : > { %2162 = vpow2.f32 %v978_v9  ;;  %682 = vst.msk [vmem:[#allocation3] sm:$0xf] %vm653_vm2, %v671_v11  ;;  %v974_v13 = vsub.f32 %v957_v53, %v968_v12  ;;  %v2151_v53 = vld [vmem:[%s3060_s18 + $0x10] sm:$0xff]  }
 0x361   : > { %v980_v14 = vmul.f32 1.442695, %v974_v13 }
 0x362   : > { %v971_v15 = vpop.xlane.xlu0 %970 }
 0x363   : > { %2164 = vpow2.f32 %v980_v14  ;;  %v975_v10 = vsub.f32 %v958_v59, %v971_v15 }
 0x365   : > { %v982_v16 = vmul.f32 1.442695, %v975_v10 }
 0x366   : > { %v1012_v17 = vld [vmem:[#allocation3] sm:$0xf] }
 0x367   : > { %2166 = vpow2.f32 %v982_v16  ;;  %v1021_v18 = vsel %vm1019_vm6, %v1012_v17, 0 }
 0x368   : > { %1971 = vmatpush3.bf16.msra.mxu0 %v1021_v18 }
 0x369   : > { %v2163_v19 = vpop.eup %2162  ;;  %1982 = vmatprep.subr.bf16.mxu0 %v2424_v0 }
 0x36a   : > { %v987_v20 = vsel %vm959_vm5, %v2163_v19, 0.0 }
 0x36b   : > { %988 = vadd.xlane.f32.xlu0 %v987_v20 }
 0x36d   : > { %v2165_v21 = vpop.eup %2164 }
 0x36e   : > { %v990_v22 = vsel %vm959_vm5, %v2165_v21, 0.0 }
 0x36f   : > { %991 = vadd.xlane.f32.xlu1 %v990_v22 }
 0x371   : > { %v2167_v25 = vpop.eup %2166 }
 0x372   : > { %v993_v27 = vsel %vm959_vm5, %v2167_v25, 0.0 }
 0x373   : > { %994 = vadd.xlane.f32.xlu0 %v993_v27 }
 0x380   : > { %674 = vrot.lane.b32.xlu1 %v2779_v26, %s2429_s25 }
 0x384   : > { %676 = vrot.lane.b32.xlu1 %v2771_v23, %s2429_s25 }
 0x389   : > { %672 = vrot.lane.b32.xlu0 %v2773_v24, %s2429_s25  ;;  %s1891_s25 = sshll.u32 %s2408_s28, 9 }
 0x38a   : > { %s2921_s16 = scalar_lea.hbm %s3064_s20, %s1891_s25 }
 0x38f   : > { %v986_v28 = vpop.xlane.xlu1 %985 }
 0x390   : > { %2168 = vrcp.f32 %v986_v28 }
 0x39a   : > { %v2169_v29 = vpop.eup %2168 }
 0x39b   : > { %v1000_v30 = vmul.f32 %v2169_v29, %v2161_v4 }
 0x39d   : > { %1004 = vst.msk [vmem:[%s2825_s24] sm:$0xff] %vm959_vm5, %v1000_v30  ;;  %v1008_v31 = vpack.c.bf16 %v1000_v30, %v1000_v30 }
 0x39f   : > { %1973 = vmatmul.mubr.msk.bf16.vlgmr.msra.gmra.mrb[12].mxu0 %vm959_vm5, %v1008_v31 }
 0x3a0   : > { %1984 = vmatprep.mubr.msk.bf16.mxu0 %vm2425_vm0, %v2424_v0 }
 0x3f8   : > { %v989_v23 = vpop.xlane.xlu0 %988 }
 0x3f9   : > { %2170 = vrcp.f32 %v989_v23 }
 0x3fc   : > { %v992_v24 = vpop.xlane.xlu1 %991 }
 0x3fd   : > { %2172 = vrcp.f32 %v992_v24 }
 0x400   : > { %v675_v26 = vpop.permute.xlu1 %674  ;;  %v995_v32 = vpop.xlane.xlu0 %994 }
 0x401   : > { %684 = vst.msk [vmem:[#allocation3 + $0x8] sm:$0xf] %vm653_vm2, %v675_v26  ;;  %2174 = vrcp.f32 %v995_v32 }
 0x403   : > { %v2171_v33 = vpop.eup %2170 }
 0x404   : > { %v1001_v34 = vmul.f32 %v2171_v33, %v2163_v19  ;;  %v677_v35 = vpop.permute.xlu1 %676  ;;  %v673_v36 = vpop.permute.xlu0 %672 }
 0x405   : > { %685 = vst.msk [vmem:[#allocation3 + $0xc] sm:$0xf] %vm653_vm2, %v677_v35  ;;  %683 = vst.msk [vmem:[#allocation3 + $0x4] sm:$0xf] %vm653_vm2, %v673_v36 }
 0x406   : > { %1005 = vst.msk [vmem:[%s2825_s24 + $0x8] sm:$0xff] %vm959_vm5, %v1001_v34  ;;  %v1009_v48 = vpack.c.bf16 %v1001_v34, %v1001_v34 }
 0x407   : > { %v2173_v37 = vpop.eup %2172 }
 0x408   : > { %v1002_v38 = vmul.f32 %v2173_v37, %v2165_v21  ;;  %v1014_v39 = vld [vmem:[#allocation3 + $0x8] sm:$0xf] }
 0x409   : > { %v1113_v40 = vsel %vm1019_vm6, %v1014_v39, 0 }
 0x40a   : > { %1006 = vst.msk [vmem:[%s2825_s24 + $0x10] sm:$0xff] %vm959_vm5, %v1002_v38  ;;  %1983 = vmatpush3.bf16.msra.mxu0 %v1113_v40  ;;  %v1010_v41 = vpack.c.bf16 %v1002_v38, %v1002_v38 }
 0x40b   : > { %v2175_v43 = vpop.eup %2174  ;;  %1994 = vmatprep.subr.bf16.mxu0 %v2424_v0 }
 0x40c   : > { %v1003_v44 = vmul.f32 %v2175_v43, %v2167_v25  ;;  %v1013_v45 = vld [vmem:[#allocation3 + $0x4] sm:$0xf]  ;;  %v1015_v47 = vld [vmem:[#allocation3 + $0xc] sm:$0xf] }
 0x40d   : > { %1985 = vmatmul.mubr.msk.bf16.vlgmr.msra.gmra.mrb[16].mxu0 %vm959_vm5, %v1010_v41  ;;  %v1067_v46 = vsel %vm1019_vm6, %v1013_v45, 0  ;;  %v1159_v49 = vsel %vm1019_vm6, %v1015_v47, 0  ;;  %v2155_v43 = vld [vmem:[#allocation10 + $0x8] sm:$0xff]   ;;  %v2158_v45 = vld [vmem:[%s3061_s7 + $0x10] sm:$0xff]  }
 0x40e   : > { %1007 = vst.msk [vmem:[%s2825_s24 + $0x18] sm:$0xff] %vm959_vm5, %v1003_v44  ;;  %1977 = vmatpush3.bf16.msra.mxu1 %v1067_v46  ;;  %1995 = vmatpush3.bf16.msra.mxu0 %v2150_v42  ;;  %v1011_v50 = vpack.c.bf16 %v1003_v44, %v1003_v44  ;;  %v2154_v42 = vld [vmem:[#allocation10] sm:$0xff]   ;;  %v2157_v44 = vld [vmem:[%s3061_s7 + $0x8] sm:$0xff]  }
 0x40f   : > { %1988 = vmatprep.subr.bf16.mxu1 %v2424_v0  ;;  %1996 = vmatprep.mubr.msk.bf16.mxu0 %vm2425_vm0, %v2424_v0 }
 0x410   : > { %2006 = vmatprep.subr.bf16.mxu0 %v2424_v0 }
 0x411   : > { %1979 = vmatmul.mubr.msk.bf16.vlgmr.msra.gmra.mrb[12].mxu1 %vm959_vm5, %v1009_v48 }
 0x412   : > { %1989 = vmatpush3.bf16.msra.mxu1 %v1159_v49  ;;  %1990 = vmatprep.mubr.msk.bf16.mxu1 %vm2425_vm0, %v2424_v0 }
 0x413   : > { %2000 = vmatprep.subr.bf16.mxu1 %v2424_v0 }
 0x419   : > { %1991 = vmatmul.mubr.msk.bf16.vlgmr.msra.gmra.mrb[16].mxu1 %vm959_vm5, %v1011_v50  ;;  %v1868_v50 = vld [vmem:[%s3062_s17] ss:$0 sm:$0xff]  ;;  %s1621_s17 = scalar_lea.sflag [#allocation14], %s2719_s14 }
 0x41a   : > { %2002 = vmatprep.mubr.msk.bf16.mxu1 %vm2425_vm0, %v2424_v0  ;;  %2001 = vmatpush3.bf16.msra.mxu1 %v2152_v51 }
 0x41b   : > { %2012 = vmatprep.subr.bf16.mxu1 %v2424_v0 }
 0x472   : > { %v1057_v52 = vpop.f32.mrb[12].mxu0 }
 0x473   : > { %v1201_v54 = vpack.c.bf16 %v1057_v52, %v1057_v52  ;;  %v1974_v55 = vpop.f32.mrb[13].mxu0  ;;  %v1869_v52 = vld [vmem:[%s3063_s22] ss:$0 sm:$0xff]  ;;  %s2298_s22 = sshll.u32 %s2430_s10, 4  ;;  %s2299_s22 = int_to_ptr.vmem [resolvable:$false] %s2298_s22 }
 0x474   : > { %v1060_v56 = vpop.f32.mrb[14].mxu0  ;;  %s2300_s24 = scalar_lea.vmem %s2299_s22, 1024  ;;  %p2301_p7 = scmp.lt.s32.totalorder %s2923_s21, %s2299_s22 }
 0x475   : > { %v1975_v57 = vpop.f32.mrb[15].mxu0  ;;  %1997 = vmatmul.mubr.msk.bf16.vlgmr.msra.gmra.mrb[20].mxu0 %vm767_vm3, %v1201_v54  ;;  %p2302_p9 = scmp.lt.s32.totalorder %s2300_s24, %s2294_s15 }
 0x476   : > { %2007 = vmatpush3.bf16.msra.mxu0 %v2151_v53  ;;  %2008 = vmatprep.mubr.msk.bf16.mxu0 %vm2425_vm0, %v2424_v0 }
 0x477   : > { %2018 = vmatprep.subr.bf16.mxu0 %v2424_v0  ;;  %p2303_p0 = por %p2302_p9, %p2301_p7 }
 0x479   : > { %p2304_p4 = pnand %p2303_p0, %p2297_p5 }
 0x4e0   : > { %v1149_v58 = vpop.f32.mrb[16].mxu0 }
 0x4e1   : > { %v1203_v59 = vpack.c.bf16 %v1149_v58, %v1149_v58  ;;  %v1986_v60 = vpop.f32.mrb[17].mxu0 }
 0x4e2   : > { %v1152_v61 = vpop.f32.mrb[18].mxu0 }
 0x4e3   : > { %v1987_v62 = vpop.f32.mrb[19].mxu0  ;;  %2009 = vmatmul.mubr.msk.bf16.vlgmr.msra.gmra.mrb[24].mxu0 %vm767_vm3, %v1203_v59 }
 0x4e4   : > { %v1103_v63 = vpop.f32.mrb[12].mxu1  ;;  %2022 = vmatprep.mubr.msk.bf16.mxu0 %vm2425_vm0, %v2424_v0  ;;  %2019 = vmatpush3.bf16.msra.mxu0 %v2154_v42 }
 0x4e5   : > { %v1202_v2 = vpack.c.bf16 %v1103_v63, %v1103_v63  ;;  %v1980_v3 = vpop.f32.mrb[13].mxu1  ;;  %2020 = vmatprep.subr.bf16.mxu0 %v2424_v0 }
 0x4e6   : > { %v1106_v4 = vpop.f32.mrb[14].mxu1 }
 0x4e7   : > { %v1981_v5 = vpop.f32.mrb[15].mxu1  ;;  %2003 = vmatmul.mubr.msk.bf16.vlgmr.msra.gmra.mrb[20].mxu1 %vm767_vm3, %v1202_v2 }
 0x4e8   : > { %2013 = vmatpush3.bf16.msra.mxu1 %v2153_v1  ;;  %2014 = vmatprep.mubr.msk.bf16.mxu1 %vm2425_vm0, %v2424_v0 }
 0x4e9   : > { %2026 = vmatprep.subr.bf16.mxu1 %v2424_v0  ;;  %2021 = vmatpush3.bf16.msra.mxu0 %v2155_v43 }
 0x4ec   : > { %v1195_v7 = vpop.f32.mrb[16].mxu1 }
 0x4ed   : > { %v1204_v8 = vpack.c.bf16 %v1195_v7, %v1195_v7  ;;  %v1992_v9 = vpop.f32.mrb[17].mxu1 }
 0x4ee   : > { %v1198_v11 = vpop.f32.mrb[18].mxu1 }
 0x4ef   : > { %v1993_v12 = vpop.f32.mrb[19].mxu1  ;;  %2015 = vmatmul.mubr.msk.bf16.vlgmr.msra.gmra.mrb[24].mxu1 %vm767_vm3, %v1204_v8 }
 0x4f0   : > { %2034 = vmatprep.mubr.msk.bf16.mxu1 %vm2425_vm0, %v2424_v0 }
 0x548   : > { %v1256_v13 = vpop.f32.mrb[20].mxu0 }
 0x549   : > { %v1998_v14 = vpop.f32.mrb[21].mxu0  ;;  %v1409_v21 = vsel %vm595_vm1, %v1256_v13, 0.0 }
 0x54a   : > { %v1259_v15 = vpop.f32.mrb[22].mxu0 }
 0x54b   : > { %v1999_v10 = vpop.f32.mrb[23].mxu0 }
 0x5b6   : > { %v1354_v16 = vpop.f32.mrb[24].mxu0 }
 0x5b7   : > { %v2010_v17 = vpop.f32.mrb[25].mxu0  ;;  %v1412_v29 = vsel %vm595_vm1, %v1354_v16, 0.0 }
 0x5b8   : > { %v1357_v18 = vpop.f32.mrb[26].mxu0 }
 0x5b9   : > { %v2011_v19 = vpop.f32.mrb[27].mxu0 }
 0x5ba   : > { %v1305_v20 = vpop.f32.mrb[20].mxu1 }
 0x5bb   : > { %v1410_v22 = vsel %vm595_vm1, %v1305_v20, 0.0  ;;  %v2004_v25 = vpop.f32.mrb[21].mxu1 }
 0x5bc   : > { %v1411_v27 = vadd.f32 %v1410_v22, %v1409_v21  ;;  %v1308_v28 = vpop.f32.mrb[22].mxu1 }
 0x5bd   : > { %v2005_v30 = vpop.f32.mrb[23].mxu1 }
 0x5be   : > { %v1413_v31 = vadd.f32 %v1412_v29, %v1411_v27 }
 0x5c2   : > { %v1403_v23 = vpop.f32.mrb[24].mxu1 }
 0x5c3   : > { %v1414_v24 = vsel %vm595_vm1, %v1403_v23, 0.0  ;;  %v2016_v26 = vpop.f32.mrb[25].mxu1 }
 0x5c4   : > { %v1415_v32 = vadd.f32 %v1414_v24, %v1413_v31  ;;  %v1406_v33 = vpop.f32.mrb[26].mxu1 }
 0x5c5   : > { %v2017_v34 = vpop.f32.mrb[27].mxu1 }
 0x5c6   : > { %v1416_v35 = vadd.f32 %v1415_v32, %v2749_v6  ;;  %v2156_v6 = vld [vmem:[%s3061_s7] sm:$0xff]  }
 0x5c7   : > { %2027 = vmatpush3.bf16.msra.mxu1 %v2156_v6 }
 0x5c8   : > { %v1419_v36 = vsel %vm595_vm1, %v1416_v35, 0.0  ;;  %2028 = vmatprep.subr.bf16.mxu1 %v2424_v0 }
 0x5c9   : > { %1420 = vadd.xlane.f32.xlu0 %v1419_v36 }
 0x5cb   : > { %2029 = vmatpush3.bf16.msra.mxu1 %v2157_v44 }
 0x5cc   : > { %2030 = vmatprep.subr.bf16.mxu1 %v2424_v0 }
 0x5cf   : > { %2031 = vmatpush3.bf16.msra.mxu1 %v2158_v45 }
 0x5d0   : > { %2032 = vmatprep.subr.bf16.mxu1 %v2424_v0  ;;  %v2159_v0 = vld [vmem:[%s3061_s7 + $0x18] sm:$0xff]  }
 0x5d3   : > { %2033 = vmatpush3.bf16.msra.mxu1 %v2159_v0 }
 0x656   : > { %v1421_v37 = vpop.xlane.xlu0 %1420 }
 0x657   : > { %v1423_v38 = vmul.f32 0.03125, %v1421_v37 }
 0x659   : > { %v1424_v39 = vsub.f32 %v1416_v35, %v1423_v38 }
 0x65b   : > { %v1425_v40 = vmul.f32 %v1424_v39, %v1424_v39 }
 0x65d   : > { %v1426_v41 = vsel %vm595_vm1, %v1425_v40, 0.0 }
 0x65e   : > { %1427 = vadd.xlane.f32.xlu1 %v1426_v41 }
 0x6eb   : > { %v1428_v46 = vpop.xlane.xlu1 %1427 }
 0x6ec   : > { %v1429_v47 = vmul.f32 0.03125, %v1428_v46 }
 0x6ee   : > { %v1430_v48 = vadd.f32 1e-05, %v1429_v47 }
 0x6f0   : > { %2176 = vrsqrt.f32 %v1430_v48 }
 0x6fa   : > { %v2177_v49 = vpop.eup %2176 }
 0x6fb   : > { %v1432_v51 = vmul.f32 %v2177_v49, %v1424_v39 }
 0x6fd   : > { %v1439_v53 = vmul.f32 %v1868_v50, %v1432_v51 }
 0x6ff   : > { %v1446_v54 = vadd.f32 %v1869_v52, %v1439_v53 }
 0x701   : > { %v1447_v55 = vpack.c.bf16 %v1446_v54, %v1446_v54 }
 0x703   : > { %2023 = vmatmul.mubr.msk.bf16.vlgmr.msra.gmra.mrb[28].mxu0 %vm595_vm1, %v1447_v55 }
 0x7d6   : > { %v1501_v56 = vpop.f32.mrb[28].mxu0 }
 0x7d7   : > { %v1507_v57 = vmax.f32 %v1501_v56, 0.0  ;;  %v2024_v58 = vpop.f32.mrb[29].mxu0 }
 0x7d8   : > { %v1504_v59 = vpop.f32.mrb[30].mxu0 }
 0x7d9   : > { %v1508_v60 = vpack.c.bf16 %v1507_v57, %v1507_v57  ;;  %v2025_v61 = vpop.f32.mrb[31].mxu0 }
 0x7db   : > { %2035 = vmatmul.mubr.msk.bf16.vlgmr.msra.gmra.mrb[28].mxu1 %vm1541_vm7, %v1508_v60 }
 0x8ae   : > { %v1579_v62 = vpop.f32.mrb[28].mxu1 }
 0x8af   : > { %v1580_v63 = vadd.f32 %v1579_v62, %v1446_v54  ;;  %v2036_v1 = vpop.f32.mrb[29].mxu1 }
 0x8b0   : > { %v1582_v2 = vpop.f32.mrb[30].mxu1 }
 0x8b1   : > { %v2037_v3 = vpop.f32.mrb[31].mxu1  ;;  %v1587_v4 = vsel %vm595_vm1, %v1580_v63, 0.0 }
 0x8b2   : > { %1588 = vadd.xlane.f32.xlu0 %v1587_v4 }
 0x93f   : > { %v1589_v5 = vpop.xlane.xlu0 %1588 }
 0x940   : > { %v1590_v7 = vmul.f32 0.03125, %v1589_v5 }
 0x942   : > { %v1591_v8 = vsub.f32 %v1580_v63, %v1590_v7 }
 0x944   : > { %v1592_v9 = vmul.f32 %v1591_v8, %v1591_v8 }
 0x946   : > { %v1593_v11 = vsel %vm595_vm1, %v1592_v9, 0.0 }
 0x947   : > { %1594 = vadd.xlane.f32.xlu0 %v1593_v11 }
 0x948   : > { %2307 = shalt.err (!%p2304_p4)
}
 0x949   : > { %s2308_s19 = scalar_lea.hbm %s2921_s16, 512  ;;  %s2312_s13 = scalar_lea.hbm %s3064_s20, 1024 }
 0x94a   : > { %p2309_p2 = scmp.ne.s32.totalorder %s2921_s16, %s2308_s19  ;;  %p2313_p12 = scmp.lt.u32.totalorder %s2921_s16, %s3064_s20 }
 0x94b   : > { %p2314_p11 = scmp.lt.u32.totalorder %s2312_s13, %s2308_s19  ;;  %p2316_p6 = scmp.lt.u32.totalorder %s2308_s19, %s2921_s16 }
 0x94c   : > { %p2310_p8 = pnand %p2309_p2, %p2664_p10 }
 0x94d   : > { %p2315_p13 = por %p2314_p11, %p2313_p12 }
 0x94e   : > { %p2311_p1 = pneg %p2310_p8 }
 0x94f   : > { %p2317_p3 = por %p2316_p6, %p2315_p13 }
 0x951   : > { %p2318_p5 = pnand %p2317_p3, %p2311_p1 }
 0x953   : > { %2321 = shalt.err (!%p2318_p5)
}
 0x954   : > { %s2431_s15 = smov 128   ;;  %s2432_s22 = smov 8  }
 0x955   : > { %2053 = dma.vmem_to_hbm [thread:$0]  (%p2664_p10), %s2923_s21, 512, %s2921_s16, %s1621_s17, %s2431_s15, %s2431_s15, %s2432_s22  }
 0x956   : > { %s3065_s11 = sld [smem:[#allocation27_spill]]  ;;  %s3066_s9 = sld [smem:[#allocation28_spill]] }
 0x957   : > { %s1882_s10 = sshll.u32 %s2408_s28, 7  ;;  %s553_s0 = scalar_lea.vmem [#allocation12], %s1835_s5 }
 0x958   : > { %s1635_s21 = sshll.u32 %s553_s0, 4  ;;  %s3067_s15 = sld [smem:[#allocation29_spill]]  ;;  %s2963_s21 = int_to_ptr.vmem [resolvable:$true] %s1635_s21 }
 0x959   : > { %s1616_s24 = scalar_lea.sflag [#allocation6], %s2719_s14  ;;  %s2322_s19 = scalar_lea.vmem %s2963_s21, 128 }
 0x95a   : > { %p2323_p7 = scmp.ne.s32.totalorder %s2963_s21, %s2322_s19  ;;  %s2433_s28 = smov [#allocation12]  }
 0x95b   : > { %s2326_s5 = sshll.u32 %s2433_s28, 4  ;;  %s2327_s5 = int_to_ptr.vmem [resolvable:$false] %s2326_s5 }
 0x95c   : > { %v1878_v10 = vld [vmem:[%s3065_s11] ss:$0 sm:$0xff]  ;;  %p2324_p9 = pnand %p2323_p7, %p2664_p10  ;;  %s2328_s11 = scalar_lea.vmem %s2327_s5, 256 }
 0x95d   : > { %v1879_v17 = vld [vmem:[%s3066_s9] ss:$0 sm:$0xff]  ;;  %p2329_p4 = scmp.lt.s32.totalorder %s2963_s21, %s2327_s5  ;;  %p2330_p2 = scmp.lt.s32.totalorder %s2328_s11, %s2322_s19 }
 0x95e   : > { %s2961_s22 = scalar_lea.hbm %s3067_s15, %s1882_s10  ;;  %p2325_p0 = pneg %p2324_p9 }
 0x95f   : > { %p2331_p8 = por %p2330_p2, %p2329_p4 }
 0x961   : > { %p2332_p1 = pnand %p2331_p8, %p2325_p0 }
 0x9d4   : > { %v1595_v12 = vpop.xlane.xlu0 %1594 }
 0x9d5   : > { %v1596_v13 = vmul.f32 0.03125, %v1595_v12 }
 0x9d7   : > { %v1597_v14 = vadd.f32 1e-05, %v1596_v13 }
 0x9d9   : > { %2178 = vrsqrt.f32 %v1597_v14 }
 0x9e3   : > { %v2179_v15 = vpop.eup %2178 }
 0x9e4   : > { %v1599_v16 = vmul.f32 %v2179_v15, %v1591_v8 }
 0x9e6   : > { %v1606_v18 = vmul.f32 %v1878_v10, %v1599_v16 }
 0x9e8   : > { %v1613_v19 = vadd.f32 %v1879_v17, %v1606_v18 }
 0x9ea   : > { %1614 = vst.msk [vmem:[%s553_s0] sm:$0xff] %vm595_vm1, %v1613_v19 }
 0x9eb   : > { %2335 = shalt.err (!%p2332_p1)
}
 0x9ec   : > { %s2336_s0 = scalar_lea.hbm %s2961_s22, 128  ;;  %s2340_s13 = scalar_lea.hbm %s3067_s15, 256 }
 0x9ed   : > { %p2337_p12 = scmp.ne.s32.totalorder %s2961_s22, %s2336_s0  ;;  %p2341_p6 = scmp.lt.u32.totalorder %s2961_s22, %s3067_s15 }
 0x9ee   : > { %p2342_p3 = scmp.lt.u32.totalorder %s2340_s13, %s2336_s0  ;;  %p2344_p7 = scmp.lt.u32.totalorder %s2336_s0, %s2961_s22 }
 0x9ef   : > { %p2338_p11 = pnand %p2337_p12, %p2664_p10 }
 0x9f0   : > { %p2343_p5 = por %p2342_p3, %p2341_p6 }
 0x9f1   : > { %p2339_p13 = pneg %p2338_p11 }
 0x9f2   : > { %p2345_p9 = por %p2344_p7, %p2343_p5 }
 0x9f4   : > { %p2346_p0 = pnand %p2345_p9, %p2339_p13 }
 0x9f6   : > { %2349 = shalt.err (!%p2346_p0)
}
 0x9f7   : > { %2052 = dma.vmem_to_hbm [thread:$0]  (%p2664_p10), %s2963_s21, 128, %s2961_s22, %s1616_s24  }
 0x9f8 PF: > { %s3068_s16 = sld [smem:[#allocation20_spill]]  ;;  %s3069_s17 = sld [smem:[#allocation21_spill]] }
 0x9f9   : > { %p3071_p2 = scmp.ge.s32.totalorder %s2416_s30, 2 }
 0x9fe   : > { %s1664_s19 = sand.u32 1, %s3068_s16   ;;  %p3070_p4 = scmp.ne.s32.totalorder %s3069_s17, 0 }
 0x9ff   : > { %s1665_s28 = scalar_lea.sflag [#allocation6], %s1664_s19 }
 0xa00   : > { %p2071_p8 = pnand %p3071_p2, %p3070_p4 }
 0xa02   : > { %2387 = dma.done.wait (!%p2071_p8), %s1665_s28, 128  }
 0xa03   : > { %2389 = vsyncadd (!%p2071_p8), %s1665_s28, 4294967168  ;;  %s1674_s5 = scalar_lea.sflag [#allocation14], %s1664_s19 }
 0xa04   : > { %2391 = dma.done.wait (!%p2071_p8), %s1674_s5, 512  }
 0xa05   : > { %2393 = vsyncadd (!%p2071_p8), %s1674_s5, 4294966784  ;;  %s35_s30 = sadd.s32 1, %s2416_s30   ;;  %s3072_s25 = smov %s2400_s26 }
 0xa06   : > { %p32_p1 = scmp.ge.s32.totalorder %s35_s30, 4   ;;  %s3073_s26 = smov %s2404_s27 }
 0xa07   : > { %s3074_s27 = smov %s2676_s12  ;;  %s3075_s28 = smov %s2412_s29 }
 0xa08   : > { %s3076_s29 = smov %s3078_s23  ;;  %34 = sbr.rel (!%p32_p1) target bundleno = 20 (0x14), region = 152 }
 0xa0f   :  { %1679 = vsyncpa [#allocation5], 1 }
 0xa10   :  { %1681 = vsyncpa [#allocation5 + $0x1], 1 }
 0xa11   :  { %1682 = vsyncpa [#allocation8], 1 }
 0xa12   :  { %1683 = vsyncpa [#allocation11], 1 }
 0xa13   :  { %1684 = vsyncpa [#allocation6], 1 }
 0xa14   :  { %1686 = vsyncpa [#allocation6 + $0x1], 1 }
 0xa15   :  { %1687 = vsyncpa [#allocation14], 1 }
 0xa16   :  { %1689 = vsyncpa [#allocation14 + $0x1], 1 }

</bundles_post_ra>
